<compile_context>
chip_gen: v5e
topology: v5e:2x2
jax: 0.10.0
libtpu: 0.0.40
codegen_flags: <defaults>
</compile_context>

<pallas_src>
import functools

import numpy as np
import jax
import jax.numpy as jnp
from jax import lax
from jax.experimental import pallas as pl
from jax.experimental.pallas import tpu as pltpu

ALPHA = 0.25
GAMMA = 2.0          # implemented as x*x (gamma == 2)
CLIP_EPS = 1e-4


def _round_up(x, m):
    return (x + m - 1) // m * m


def _focal_kernel(cls_ref, reg_ref, anc_ref, ann_ref, out_ref,
                  cls_acc, pos_acc, reg_acc, *, tile_a, num_anchors):
    # cls_ref: (1, C, TA)   reg_ref: (1, 4, TA)   anc_ref: (4, A_pad) resident
    # ann_ref: (1, M, 5)    out_ref: (1, 1, 128)  lanes: [cls_sum, n_pos, reg_sum, ...]
    # cls_acc / pos_acc / reg_acc: (1, TA) f32 per-anchor partial sums (VMEM scratch)
    t = pl.program_id(1)
    n_t = pl.num_programs(1)

    @pl.when(t == 0)
    def _():
        cls_acc[...] = jnp.zeros_like(cls_acc)
        pos_acc[...] = jnp.zeros_like(pos_acc)
        reg_acc[...] = jnp.zeros_like(reg_acc)
        out_ref[...] = jnp.zeros_like(out_ref)

    p = jnp.clip(cls_ref[0], CLIP_EPS, 1.0 - CLIP_EPS)          # (C, TA)
    reg = reg_ref[0]                                            # (4, TA)
    ann = ann_ref[0]                                            # (M, 5)

    start = pl.multiple_of(t * tile_a, 128)
    anc = anc_ref[:, pl.ds(start, tile_a)]                      # (4, TA) slice of resident block

    C = p.shape[0]
    M = ann.shape[0]

    # anchors: rows on lanes (1, TA)
    ax1, ay1, ax2, ay2 = anc[0:1, :], anc[1:2, :], anc[2:3, :], anc[3:4, :]
    aw = ax2 - ax1
    ah = ay2 - ay1
    acx = ax1 + 0.5 * aw
    acy = ay1 + 0.5 * ah

    # GT boxes as column vectors (M, 1)
    gx1, gy1, gx2, gy2, gcls = (ann[:, 0:1], ann[:, 1:2], ann[:, 2:3],
                                ann[:, 3:4], ann[:, 4:5])
    valid_gt = gcls != -1.0                                     # (M, 1)

    # pairwise IoU (M, TA); padded annotations masked to -1
    iw = jnp.maximum(jnp.minimum(ax2, gx2) - jnp.maximum(ax1, gx1), 0.0)
    ih = jnp.maximum(jnp.minimum(ay2, gy2) - jnp.maximum(ay1, gy1), 0.0)
    inter = iw * ih
    area_a = aw * ah
    area_g = (gx2 - gx1) * (gy2 - gy1)
    union = jnp.maximum(area_a + area_g - inter, 1e-8)
    iou = jnp.where(valid_gt, inter / union, -1.0)

    iou_max = jnp.max(iou, axis=0, keepdims=True)               # (1, TA)
    idx_m = lax.broadcasted_iota(jnp.int32, (M, tile_a), 0)
    is_max = iou == iou_max
    iou_arg = jnp.min(jnp.where(is_max, idx_m, M), axis=0, keepdims=True)
    onehot = (idx_m == iou_arg).astype(jnp.float32)             # (M, TA)

    def gather(col):                                            # (M, 1) -> (1, TA)
        return jnp.sum(onehot * col, axis=0, keepdims=True)

    # anchor-validity mask (ragged A handled by padding + masking)
    a_idx = start + lax.broadcasted_iota(jnp.int32, (1, tile_a), 1)
    valid_a = (a_idx < num_anchors).astype(jnp.float32)         # (1, TA)

    pos = iou_max >= 0.5                                        # (1, TA)
    lt04 = iou_max < 0.4
    pos_f = pos.astype(jnp.float32) * valid_a

    assigned_cls = gather(gcls).astype(jnp.int32)               # (1, TA)
    row_c = lax.broadcasted_iota(jnp.int32, (C, tile_a), 0)
    cls_onehot = row_c == assigned_cls                          # (C, TA)

    is_one = pos & cls_onehot                                   # targets == 1
    not_ignored = is_one | (pos | lt04)                         # targets != -1

    alpha_factor = jnp.where(is_one, ALPHA, 1.0 - ALPHA)
    focal_weight = jnp.where(is_one, 1.0 - p, p)
    focal_weight = alpha_factor * focal_weight * focal_weight   # gamma == 2
    bce = -jnp.log(jnp.where(is_one, p, 1.0 - p))               # single log (EUP) per element
    cls_loss = jnp.where(not_ignored, focal_weight * bce, 0.0)
    per_anchor_cls = jnp.sum(cls_loss, axis=0, keepdims=True) * valid_a   # (1, TA)

    # regression targets from the assigned (argmax) annotation
    g_w_raw = gx2 - gx1
    g_h_raw = gy2 - gy1
    g_cx = gather(gx1 + 0.5 * g_w_raw)
    g_cy = gather(gy1 + 0.5 * g_h_raw)
    g_w = gather(jnp.maximum(g_w_raw, 1.0))
    g_h = gather(jnp.maximum(g_h_raw, 1.0))

    dx = (g_cx - acx) / aw / 0.1
    dy = (g_cy - acy) / ah / 0.1
    dw = jnp.log(g_w / aw) / 0.2
    dh = jnp.log(g_h / ah) / 0.2

    def smooth_l1(d):
        ad = jnp.abs(d)
        return jnp.where(ad <= 1.0 / 9.0, 0.5 * 9.0 * ad * ad, ad - 0.5 / 9.0)

    per_anchor_reg = (smooth_l1(dx - reg[0:1, :]) + smooth_l1(dy - reg[1:2, :])
                      + smooth_l1(dw - reg[2:3, :]) + smooth_l1(dh - reg[3:4, :]))
    per_anchor_reg = per_anchor_reg * pos_f                     # (1, TA)

    # pure-VPU accumulation; no cross-lane reductions in the hot loop
    cls_acc[...] += per_anchor_cls
    pos_acc[...] += pos_f
    reg_acc[...] += per_anchor_reg

    @pl.when(t == n_t - 1)
    def _():
        cls_sum = jnp.sum(cls_acc[...])
        n_pos = jnp.sum(pos_acc[...])
        reg_sum = jnp.sum(reg_acc[...])
        lane = lax.broadcasted_iota(jnp.int32, (1, 1, 128), 2)
        out_ref[...] = jnp.where(lane == 0, cls_sum,
                       jnp.where(lane == 1, n_pos,
                       jnp.where(lane == 2, reg_sum, 0.0)))


def focal_loss_pallas(classifications, regressions, anchors, annotations, *, tile_a=2048):
    B, A, C = classifications.shape
    M = annotations.shape[1]

    # tile sizing: multiple of 128, capped so small problems use a single fat step
    tile_a = max(128, _round_up(int(tile_a), 128))
    tile_a = min(tile_a, _round_up(A, 128))
    A_pad = _round_up(A, tile_a)
    pad = A_pad - A

    cls = classifications.astype(jnp.float32)
    reg = regressions.astype(jnp.float32)
    anc = anchors[0].astype(jnp.float32)
    ann = annotations.astype(jnp.float32)

    if pad:
        cls = jnp.pad(cls, ((0, 0), (0, pad), (0, 0)), constant_values=0.5)
        reg = jnp.pad(reg, ((0, 0), (0, pad), (0, 0)))
        pad_box = jnp.tile(jnp.asarray([[0.0, 0.0, 1.0, 1.0]], jnp.float32), (pad, 1))
        anc = jnp.concatenate([anc, pad_box], axis=0)

    # anchor axis onto lanes (lane-dense layout)
    cls_t = jnp.transpose(cls, (0, 2, 1))            # (B, C, A_pad)
    reg_t = jnp.transpose(reg, (0, 2, 1))            # (B, 4, A_pad)
    anc_t = jnp.transpose(anc, (1, 0))               # (4, A_pad)

    kernel = functools.partial(_focal_kernel, tile_a=tile_a, num_anchors=A)

    acc = pl.pallas_call(
        kernel,
        out_shape=jax.ShapeDtypeStruct((B, 1, 128), jnp.float32),
        grid_spec=pltpu.PrefetchScalarGridSpec(
            num_scalar_prefetch=0,
            grid=(B, A_pad // tile_a),
            in_specs=[
                pl.BlockSpec((1, C, tile_a), lambda b, t: (b, 0, t)),
                pl.BlockSpec((1, 4, tile_a), lambda b, t: (b, 0, t)),
                pl.BlockSpec((4, A_pad), lambda b, t: (0, 0)),       # grid-resident anchors
                pl.BlockSpec((1, M, 5), lambda b, t: (b, 0, 0)),     # re-fetched only when b changes
            ],
            out_specs=pl.BlockSpec((1, 1, 128), lambda b, t: (b, 0, 0)),
            scratch_shapes=[
                pltpu.VMEM((1, tile_a), jnp.float32),
                pltpu.VMEM((1, tile_a), jnp.float32),
                pltpu.VMEM((1, tile_a), jnp.float32),
            ],
        ),
        compiler_params=pltpu.CompilerParams(
            dimension_semantics=("parallel", "arbitrary"),
            vmem_limit_bytes=48 * 1024 * 1024,
        ),
    )(cls_t, reg_t, anc_t, ann)

    cls_sum = acc[:, 0, 0]
    n_pos = acc[:, 0, 1]
    reg_sum = acc[:, 0, 2]

    cls_per_img = cls_sum / jnp.maximum(n_pos, 1.0)
    reg_per_img = jnp.where(n_pos > 0.0,
                            reg_sum / jnp.maximum(4.0 * n_pos, 1.0),
                            0.0)
    # TODO(synk): the PyTorch empty-annotation branch (dynamic per-image filtering; the
    # reference would crash on torch.max of an empty tensor) is not replicated; padded
    # annotations are handled by masking and inputs always contain >= 1 valid GT per image.
    cls_losses = jnp.mean(cls_per_img, keepdims=True)   # shape (1,), like torch keepdim
    reg_losses = jnp.mean(reg_per_img, keepdims=True)
    return cls_losses, reg_losses


def focal_loss_ref(cls_np, reg_np, anchors_np, ann_np):
    """Pure-numpy reference mirroring the PyTorch forward."""
    alpha, gamma = ALPHA, GAMMA
    B = cls_np.shape[0]
    anchor = anchors_np[0]
    aw = anchor[:, 2] - anchor[:, 0]
    ah = anchor[:, 3] - anchor[:, 1]
    acx = anchor[:, 0] + 0.5 * aw
    acy = anchor[:, 1] + 0.5 * ah
    cls_losses, reg_losses = [], []
    for j in range(B):
        c = np.clip(cls_np[j], CLIP_EPS, 1 - CLIP_EPS)
        r = reg_np[j]
        ann = ann_np[j]
        ann = ann[ann[:, 4] != -1]
        area_g = (ann[:, 2] - ann[:, 0]) * (ann[:, 3] - ann[:, 1])
        area_a = aw * ah
        iw = np.minimum(anchor[:, 2][:, None], ann[None, :, 2]) - \
             np.maximum(anchor[:, 0][:, None], ann[None, :, 0])
        ih = np.minimum(anchor[:, 3][:, None], ann[None, :, 3]) - \
             np.maximum(anchor[:, 1][:, None], ann[None, :, 1])
        inter = np.clip(iw, 0, None) * np.clip(ih, 0, None)
        union = np.maximum(area_a[:, None] + area_g[None, :] - inter, 1e-8)
        iou = inter / union
        iou_max = iou.max(1)
        iou_arg = iou.argmax(1)
        A, C = c.shape
        targets = -np.ones((A, C), np.float32)
        targets[iou_max < 0.4] = 0
        pos = iou_max >= 0.5
        npos = int(pos.sum())
        assigned = ann[iou_arg]
        targets[pos] = 0
        targets[pos, assigned[pos, 4].astype(int)] = 1
        af = np.where(targets == 1, alpha, 1 - alpha)
        fw = np.where(targets == 1, 1 - c, c)
        fw = af * fw ** gamma
        bce = -(targets * np.log(c) + (1 - targets) * np.log(1 - c))
        cl = np.where(targets != -1, fw * bce, 0.0)
        cls_losses.append(cl.sum() / max(npos, 1))
        if npos > 0:
            ap = assigned[pos]
            gw = ap[:, 2] - ap[:, 0]
            gh = ap[:, 3] - ap[:, 1]
            gcx = ap[:, 0] + 0.5 * gw
            gcy = ap[:, 1] + 0.5 * gh
            gw = np.clip(gw, 1, None)
            gh = np.clip(gh, 1, None)
            dx = (gcx - acx[pos]) / aw[pos] / 0.1
            dy = (gcy - acy[pos]) / ah[pos] / 0.1
            dw = np.log(gw / aw[pos]) / 0.2
            dh = np.log(gh / ah[pos]) / 0.2
            tg = np.stack([dx, dy, dw, dh], axis=1)
            diff = np.abs(tg - r[pos])
            rl = np.where(diff <= 1 / 9, 0.5 * 9 * diff ** 2, diff - 0.5 / 9)
            reg_losses.append(rl.mean())
        else:
            reg_losses.append(0.0)
    return (np.array([np.mean(cls_losses)], np.float32),
            np.array([np.mean(reg_losses)], np.float32))


if __name__ == "__main__":
    key = jax.random.PRNGKey(0)
    B, A, C, M = 2, 300, 8, 8          # A deliberately not a multiple of 128
    k1, k2, k3, k4, k5 = jax.random.split(key, 5)

    # deterministic synthetic anchors (xyxy, positive widths/heights)
    cx = jax.random.uniform(k1, (A,), minval=10.0, maxval=90.0)
    cy = jax.random.uniform(k2, (A,), minval=10.0, maxval=90.0)
    wh = jax.random.uniform(k3, (A, 2), minval=8.0, maxval=32.0)
    anchors = jnp.stack([cx - wh[:, 0] / 2, cy - wh[:, 1] / 2,
                         cx + wh[:, 0] / 2, cy + wh[:, 1] / 2], axis=1)[None]  # (1, A, 4)
    anchors_np = np.asarray(anchors[0], np.float32)

    # annotations: copies of a few anchors (guarantees positives), rest padded with class -1
    ann = np.zeros((B, M, 5), np.float32)
    ann[:, :, 4] = -1.0
    rng = np.random.RandomState(0)
    for j, idxs in enumerate([[3, 50, 120, 200, 30], [10, 77, 150]]):
        for i, a_i in enumerate(idxs):
            ann[j, i, :4] = anchors_np[a_i]
            ann[j, i, 4] = rng.randint(0, C)
    annotations = jnp.asarray(ann)

    classifications = jax.nn.sigmoid(jax.random.normal(k4, (B, A, C))).astype(jnp.float32)
    regressions = (0.1 * jax.random.normal(k5, (B, A, 4))).astype(jnp.float32)

    cls_ref_v, reg_ref_v = focal_loss_ref(np.asarray(classifications, np.float32),
                                          np.asarray(regressions, np.float32),
                                          np.asarray(anchors, np.float32), ann)

    # default (large) tile: single fat anchor step per image
    cls_l, reg_l = focal_loss_pallas(classifications, regressions, anchors, annotations)
    jax.block_until_ready((cls_l, reg_l))
    np.testing.assert_allclose(np.asarray(cls_l), cls_ref_v, rtol=2e-3, atol=1e-4)
    np.testing.assert_allclose(np.asarray(reg_l), reg_ref_v, rtol=2e-3, atol=1e-4)

    # small tile: exercises multi-step scratch accumulation + ragged-anchor masking
    cls_s, reg_s = focal_loss_pallas(classifications, regressions, anchors, annotations,
                                     tile_a=128)
    jax.block_until_ready((cls_s, reg_s))
    np.testing.assert_allclose(np.asarray(cls_s), cls_ref_v, rtol=2e-3, atol=1e-4)
    np.testing.assert_allclose(np.asarray(reg_s), reg_ref_v, rtol=2e-3, atol=1e-4)

    print("KERNEL_OK")
</pallas_src>

<mosaic_0001>
module attributes {stable_mosaic.version = 11 : i64} {
  func.func @_focal_kernel(%arg0: i32, %arg1: i32, %arg2: memref<1x8x384xf32, #tpu.memory_space<vmem>>, %arg3: memref<1x4x384xf32, #tpu.memory_space<vmem>>, %arg4: memref<4x384xf32, #tpu.memory_space<vmem>>, %arg5: memref<1x8x5xf32, #tpu.memory_space<vmem>>, %arg6: memref<1x1x128xf32, #tpu.memory_space<vmem>>, %arg7: memref<1x384xf32, #tpu.memory_space<vmem>>, %arg8: memref<1x384xf32, #tpu.memory_space<vmem>>, %arg9: memref<1x384xf32, #tpu.memory_space<vmem>>) attributes {dimension_semantics = [#tpu.dimension_semantics<parallel>, #tpu.dimension_semantics<arbitrary>], iteration_bounds = array<i64: 2, 1>, scalar_prefetch = 0 : i64, scratch_operands = 3 : i64, tpu.core_type = #tpu.core_type<tc>, window_params = [{transform_indices = @transform_0, window_bounds = array<i64: 1, 8, 384>}, {transform_indices = @transform_1, window_bounds = array<i64: 1, 4, 384>}, {pipeline_mode = #tpu.pipeline_mode<synchronous>, transform_indices = @transform_2, window_bounds = array<i64: 4, 384>}, {transform_indices = @transform_3, window_bounds = array<i64: 1, 8, 5>}, {transform_indices = @transform_4, window_bounds = array<i64: 1, 1, 128>}]} {
    %c0_i32 = arith.constant 0 : i32
    %0 = arith.cmpi eq, %arg1, %c0_i32 : i32
    %1 = arith.extui %0 : i1 to i32
    %c0_i32_0 = arith.constant 0 : i32
    %2 = arith.cmpi ne, %1, %c0_i32_0 : i32
    scf.if %2 {
      %cst_68 = arith.constant 0.000000e+00 : f32
      %234 = vector.broadcast %cst_68 : f32 to vector<1x384xf32>
      %c0_69 = arith.constant 0 : index
      %c0_70 = arith.constant 0 : index
      %235 = vector.load %arg7[%c0_69, %c0_70] : memref<1x384xf32, #tpu.memory_space<vmem>>, vector<1x384xf32>
      tpu.vector_store %arg7[%c0_69, %c0_70], %234 {strides = array<i32>} : memref<1x384xf32, #tpu.memory_space<vmem>>, vector<1x384xf32>,
      %cst_71 = arith.constant 0.000000e+00 : f32
      %236 = vector.broadcast %cst_71 : f32 to vector<1x384xf32>
      %c0_72 = arith.constant 0 : index
      %c0_73 = arith.constant 0 : index
      %237 = vector.load %arg8[%c0_72, %c0_73] : memref<1x384xf32, #tpu.memory_space<vmem>>, vector<1x384xf32>
      tpu.vector_store %arg8[%c0_72, %c0_73], %236 {strides = array<i32>} : memref<1x384xf32, #tpu.memory_space<vmem>>, vector<1x384xf32>,
      %cst_74 = arith.constant 0.000000e+00 : f32
      %238 = vector.broadcast %cst_74 : f32 to vector<1x384xf32>
      %c0_75 = arith.constant 0 : index
      %c0_76 = arith.constant 0 : index
      %239 = vector.load %arg9[%c0_75, %c0_76] : memref<1x384xf32, #tpu.memory_space<vmem>>, vector<1x384xf32>
      tpu.vector_store %arg9[%c0_75, %c0_76], %238 {strides = array<i32>} : memref<1x384xf32, #tpu.memory_space<vmem>>, vector<1x384xf32>,
      %cst_77 = arith.constant 0.000000e+00 : f32
      %240 = vector.broadcast %cst_77 : f32 to vector<1x1x128xf32>
      %c0_78 = arith.constant 0 : index
      %c0_79 = arith.constant 0 : index
      %c0_80 = arith.constant 0 : index
      %241 = vector.load %arg6[%c0_78, %c0_79, %c0_80] : memref<1x1x128xf32, #tpu.memory_space<vmem>>, vector<1x1x128xf32>
      tpu.vector_store %arg6[%c0_78, %c0_79, %c0_80], %240 {strides = array<i32>} : memref<1x1x128xf32, #tpu.memory_space<vmem>>, vector<1x1x128xf32>,
    } else {
    }
    %c0 = arith.constant 0 : index
    %c0_1 = arith.constant 0 : index
    %c0_2 = arith.constant 0 : index
    %3 = vector.load %arg2[%c0, %c0_1, %c0_2] : memref<1x8x384xf32, #tpu.memory_space<vmem>>, vector<1x8x384xf32>
    %4 = vector.shape_cast %3 : vector<1x8x384xf32> to vector<8x384xf32>
    %cst = arith.constant 9.99999974E-5 : f32
    %cst_3 = arith.constant 0.999899983 : f32
    %5 = vector.broadcast %cst : f32 to vector<8x384xf32>
    %6 = arith.maximumf %5, %4 : vector<8x384xf32>
    %7 = vector.broadcast %cst_3 : f32 to vector<8x384xf32>
    %8 = arith.minimumf %7, %6 : vector<8x384xf32>
    %c0_4 = arith.constant 0 : index
    %c0_5 = arith.constant 0 : index
    %c0_6 = arith.constant 0 : index
    %9 = vector.load %arg3[%c0_4, %c0_5, %c0_6] : memref<1x4x384xf32, #tpu.memory_space<vmem>>, vector<1x4x384xf32>
    %10 = vector.shape_cast %9 : vector<1x4x384xf32> to vector<4x384xf32>
    %c0_7 = arith.constant 0 : index
    %c0_8 = arith.constant 0 : index
    %c0_9 = arith.constant 0 : index
    %11 = vector.load %arg5[%c0_7, %c0_8, %c0_9] : memref<1x8x5xf32, #tpu.memory_space<vmem>>, vector<1x8x5xf32>
    %12 = vector.shape_cast %11 : vector<1x8x5xf32> to vector<8x5xf32>
    %c384_i32 = arith.constant 384 : i32
    %13 = arith.muli %arg1, %c384_i32 : i32
    %14 = tpu.assume_multiple %13, 128 : i32
    %c0_10 = arith.constant 0 : index
    %15 = arith.index_cast %14 : i32 to index
    %16 = vector.load %arg4[%c0_10, %15] : memref<4x384xf32, #tpu.memory_space<vmem>>, vector<4x384xf32>
    %17 = vector.extract_strided_slice %16 {offsets = [0, 0], sizes = [1, 384], strides = [1, 1]} : vector<4x384xf32> to vector<1x384xf32>
    %18 = vector.extract_strided_slice %16 {offsets = [1, 0], sizes = [1, 384], strides = [1, 1]} : vector<4x384xf32> to vector<1x384xf32>
    %19 = vector.extract_strided_slice %16 {offsets = [2, 0], sizes = [1, 384], strides = [1, 1]} : vector<4x384xf32> to vector<1x384xf32>
    %20 = vector.extract_strided_slice %16 {offsets = [3, 0], sizes = [1, 384], strides = [1, 1]} : vector<4x384xf32> to vector<1x384xf32>
    %21 = arith.subf %19, %17 : vector<1x384xf32>
    %22 = arith.subf %20, %18 : vector<1x384xf32>
    %cst_11 = arith.constant 5.000000e-01 : f32
    %23 = vector.broadcast %cst_11 : f32 to vector<1x384xf32>
    %24 = arith.mulf %23, %21 : vector<1x384xf32>
    %25 = arith.addf %17, %24 : vector<1x384xf32>
    %cst_12 = arith.constant 5.000000e-01 : f32
    %26 = vector.broadcast %cst_12 : f32 to vector<1x384xf32>
    %27 = arith.mulf %26, %22 : vector<1x384xf32>
    %28 = arith.addf %18, %27 : vector<1x384xf32>
    %29 = vector.extract_strided_slice %12 {offsets = [0, 0], sizes = [8, 1], strides = [1, 1]} : vector<8x5xf32> to vector<8x1xf32>
    %30 = vector.extract_strided_slice %12 {offsets = [0, 1], sizes = [8, 1], strides = [1, 1]} : vector<8x5xf32> to vector<8x1xf32>
    %31 = vector.extract_strided_slice %12 {offsets = [0, 2], sizes = [8, 1], strides = [1, 1]} : vector<8x5xf32> to vector<8x1xf32>
    %32 = vector.extract_strided_slice %12 {offsets = [0, 3], sizes = [8, 1], strides = [1, 1]} : vector<8x5xf32> to vector<8x1xf32>
    %33 = vector.extract_strided_slice %12 {offsets = [0, 4], sizes = [8, 1], strides = [1, 1]} : vector<8x5xf32> to vector<8x1xf32>
    %cst_13 = arith.constant -1.000000e+00 : f32
    %34 = vector.broadcast %cst_13 : f32 to vector<8x1xf32>
    %35 = arith.cmpf one, %33, %34 : vector<8x1xf32>
    %36 = vector.broadcast %19 : vector<1x384xf32> to vector<8x384xf32>
    %37 = vector.broadcast %31 : vector<8x1xf32> to vector<8x384xf32>
    %38 = arith.minimumf %36, %37 : vector<8x384xf32>
    %39 = vector.broadcast %17 : vector<1x384xf32> to vector<8x384xf32>
    %40 = vector.broadcast %29 : vector<8x1xf32> to vector<8x384xf32>
    %41 = arith.maximumf %39, %40 : vector<8x384xf32>
    %42 = arith.subf %38, %41 : vector<8x384xf32>
    %cst_14 = arith.constant 0.000000e+00 : f32
    %43 = vector.broadcast %cst_14 : f32 to vector<8x384xf32>
    %44 = arith.maximumf %42, %43 : vector<8x384xf32>
    %45 = vector.broadcast %20 : vector<1x384xf32> to vector<8x384xf32>
    %46 = vector.broadcast %32 : vector<8x1xf32> to vector<8x384xf32>
    %47 = arith.minimumf %45, %46 : vector<8x384xf32>
    %48 = vector.broadcast %18 : vector<1x384xf32> to vector<8x384xf32>
    %49 = vector.broadcast %30 : vector<8x1xf32> to vector<8x384xf32>
    %50 = arith.maximumf %48, %49 : vector<8x384xf32>
    %51 = arith.subf %47, %50 : vector<8x384xf32>
    %cst_15 = arith.constant 0.000000e+00 : f32
    %52 = vector.broadcast %cst_15 : f32 to vector<8x384xf32>
    %53 = arith.maximumf %51, %52 : vector<8x384xf32>
    %54 = arith.mulf %44, %53 : vector<8x384xf32>
    %55 = arith.mulf %21, %22 : vector<1x384xf32>
    %56 = arith.subf %31, %29 : vector<8x1xf32>
    %57 = arith.subf %32, %30 : vector<8x1xf32>
    %58 = arith.mulf %56, %57 : vector<8x1xf32>
    %59 = vector.broadcast %55 : vector<1x384xf32> to vector<8x384xf32>
    %60 = vector.broadcast %58 : vector<8x1xf32> to vector<8x384xf32>
    %61 = arith.addf %59, %60 : vector<8x384xf32>
    %62 = arith.subf %61, %54 : vector<8x384xf32>
    %cst_16 = arith.constant 9.99999993E-9 : f32
    %63 = vector.broadcast %cst_16 : f32 to vector<8x384xf32>
    %64 = arith.maximumf %62, %63 : vector<8x384xf32>
    %65 = arith.divf %54, %64 : vector<8x384xf32>
    %cst_17 = arith.constant -1.000000e+00 : f32
    %66 = vector.shape_cast %35 : vector<8x1xi1> to vector<8x1xi1>
    %67 = vector.broadcast %66 : vector<8x1xi1> to vector<8x384xi1>
    %68 = vector.broadcast %cst_17 : f32 to vector<8x384xf32>
    %69 = arith.select %67, %65, %68 : vector<8x384xi1>, vector<8x384xf32>
    %cst_18 = arith.constant dense<0xFF800000> : vector<384xf32>
    %70 = vector.multi_reduction <maximumf>, %69, %cst_18 [0] : vector<8x384xf32> to vector<384xf32>
    %71 = vector.shape_cast %70 : vector<384xf32> to vector<1x384xf32>
    %72 = tpu.iota {dimensions = array<i32: 0>} : vector<8x384xi32>
    %73 = vector.broadcast %71 : vector<1x384xf32> to vector<8x384xf32>
    %74 = arith.cmpf oeq, %69, %73 : vector<8x384xf32>
    %c8_i32 = arith.constant 8 : i32
    %75 = vector.broadcast %c8_i32 : i32 to vector<8x384xi32>
    %76 = arith.select %74, %72, %75 : vector<8x384xi1>, vector<8x384xi32>
    %cst_19 = arith.constant dense<2147483647> : vector<384xi32>
    %77 = vector.multi_reduction <minsi>, %76, %cst_19 [0] : vector<8x384xi32> to vector<384xi32>
    %78 = vector.shape_cast %77 : vector<384xi32> to vector<1x384xi32>
    %79 = vector.broadcast %78 : vector<1x384xi32> to vector<8x384xi32>
    %80 = arith.cmpi eq, %72, %79 : vector<8x384xi32>
    %81 = arith.extui %80 : vector<8x384xi1> to vector<8x384xi32>
    %82 = arith.sitofp %81 : vector<8x384xi32> to vector<8x384xf32>
    %83 = tpu.iota {dimensions = array<i32: 1>} : vector<1x384xi32>
    %84 = vector.broadcast %14 : i32 to vector<1x384xi32>
    %85 = arith.addi %84, %83 : vector<1x384xi32>
    %c300_i32 = arith.constant 300 : i32
    %86 = vector.broadcast %c300_i32 : i32 to vector<1x384xi32>
    %87 = arith.cmpi slt, %85, %86 : vector<1x384xi32>
    %88 = arith.extui %87 : vector<1x384xi1> to vector<1x384xi32>
    %89 = arith.sitofp %88 : vector<1x384xi32> to vector<1x384xf32>
    %cst_20 = arith.constant 5.000000e-01 : f32
    %90 = vector.broadcast %cst_20 : f32 to vector<1x384xf32>
    %91 = arith.cmpf oge, %71, %90 : vector<1x384xf32>
    %cst_21 = arith.constant 4.000000e-01 : f32
    %92 = vector.broadcast %cst_21 : f32 to vector<1x384xf32>
    %93 = arith.cmpf olt, %71, %92 : vector<1x384xf32>
    %94 = arith.extui %91 : vector<1x384xi1> to vector<1x384xi32>
    %95 = arith.sitofp %94 : vector<1x384xi32> to vector<1x384xf32>
    %96 = arith.mulf %95, %89 : vector<1x384xf32>
    %97 = vector.broadcast %33 : vector<8x1xf32> to vector<8x384xf32>
    %98 = arith.mulf %82, %97 : vector<8x384xf32>
    %cst_22 = arith.constant dense<0.000000e+00> : vector<384xf32>
    %99 = vector.multi_reduction <add>, %98, %cst_22 [0] : vector<8x384xf32> to vector<384xf32>
    %100 = vector.shape_cast %99 : vector<384xf32> to vector<1x384xf32>
    %101 = arith.fptosi %100 : vector<1x384xf32> to vector<1x384xi32>
    %102 = tpu.iota {dimensions = array<i32: 0>} : vector<8x384xi32>
    %103 = vector.broadcast %101 : vector<1x384xi32> to vector<8x384xi32>
    %104 = arith.cmpi eq, %102, %103 : vector<8x384xi32>
    %105 = vector.broadcast %91 : vector<1x384xi1> to vector<8x384xi1>
    %106 = arith.andi %105, %104 : vector<8x384xi1>
    %107 = arith.ori %91, %93 : vector<1x384xi1>
    %108 = vector.broadcast %107 : vector<1x384xi1> to vector<8x384xi1>
    %109 = arith.ori %106, %108 : vector<8x384xi1>
    %cst_23 = arith.constant 2.500000e-01 : f32
    %cst_24 = arith.constant 7.500000e-01 : f32
    %110 = vector.broadcast %cst_23 : f32 to vector<8x384xf32>
    %111 = vector.broadcast %cst_24 : f32 to vector<8x384xf32>
    %112 = arith.select %106, %110, %111 : vector<8x384xi1>, vector<8x384xf32>
    %cst_25 = arith.constant 1.000000e+00 : f32
    %113 = vector.broadcast %cst_25 : f32 to vector<8x384xf32>
    %114 = arith.subf %113, %8 : vector<8x384xf32>
    %115 = arith.select %106, %114, %8 : vector<8x384xi1>, vector<8x384xf32>
    %116 = arith.mulf %112, %115 : vector<8x384xf32>
    %117 = arith.mulf %116, %115 : vector<8x384xf32>
    %cst_26 = arith.constant 1.000000e+00 : f32
    %118 = vector.broadcast %cst_26 : f32 to vector<8x384xf32>
    %119 = arith.subf %118, %8 : vector<8x384xf32>
    %120 = arith.select %106, %8, %119 : vector<8x384xi1>, vector<8x384xf32>
    %121 = math.log %120 : vector<8x384xf32>
    %cst_27 = arith.constant 0.000000e+00 : f32
    %122 = vector.broadcast %cst_27 : f32 to vector<8x384xf32>
    %123 = arith.subf %122, %121 : vector<8x384xf32>
    %124 = arith.mulf %117, %123 : vector<8x384xf32>
    %cst_28 = arith.constant 0.000000e+00 : f32
    %125 = vector.broadcast %cst_28 : f32 to vector<8x384xf32>
    %126 = arith.select %109, %124, %125 : vector<8x384xi1>, vector<8x384xf32>
    %cst_29 = arith.constant dense<0.000000e+00> : vector<384xf32>
    %127 = vector.multi_reduction <add>, %126, %cst_29 [0] : vector<8x384xf32> to vector<384xf32>
    %128 = vector.shape_cast %127 : vector<384xf32> to vector<1x384xf32>
    %129 = arith.mulf %128, %89 : vector<1x384xf32>
    %130 = arith.subf %31, %29 : vector<8x1xf32>
    %131 = arith.subf %32, %30 : vector<8x1xf32>
    %cst_30 = arith.constant 5.000000e-01 : f32
    %132 = vector.broadcast %cst_30 : f32 to vector<8x1xf32>
    %133 = arith.mulf %132, %130 : vector<8x1xf32>
    %134 = arith.addf %29, %133 : vector<8x1xf32>
    %135 = vector.broadcast %134 : vector<8x1xf32> to vector<8x384xf32>
    %136 = arith.mulf %82, %135 : vector<8x384xf32>
    %cst_31 = arith.constant dense<0.000000e+00> : vector<384xf32>
    %137 = vector.multi_reduction <add>, %136, %cst_31 [0] : vector<8x384xf32> to vector<384xf32>
    %138 = vector.shape_cast %137 : vector<384xf32> to vector<1x384xf32>
    %cst_32 = arith.constant 5.000000e-01 : f32
    %139 = vector.broadcast %cst_32 : f32 to vector<8x1xf32>
    %140 = arith.mulf %139, %131 : vector<8x1xf32>
    %141 = arith.addf %30, %140 : vector<8x1xf32>
    %142 = vector.broadcast %141 : vector<8x1xf32> to vector<8x384xf32>
    %143 = arith.mulf %82, %142 : vector<8x384xf32>
    %cst_33 = arith.constant dense<0.000000e+00> : vector<384xf32>
    %144 = vector.multi_reduction <add>, %143, %cst_33 [0] : vector<8x384xf32> to vector<384xf32>
    %145 = vector.shape_cast %144 : vector<384xf32> to vector<1x384xf32>
    %cst_34 = arith.constant 1.000000e+00 : f32
    %146 = vector.broadcast %cst_34 : f32 to vector<8x1xf32>
    %147 = arith.maximumf %130, %146 : vector<8x1xf32>
    %148 = vector.broadcast %147 : vector<8x1xf32> to vector<8x384xf32>
    %149 = arith.mulf %82, %148 : vector<8x384xf32>
    %cst_35 = arith.constant dense<0.000000e+00> : vector<384xf32>
    %150 = vector.multi_reduction <add>, %149, %cst_35 [0] : vector<8x384xf32> to vector<384xf32>
    %151 = vector.shape_cast %150 : vector<384xf32> to vector<1x384xf32>
    %cst_36 = arith.constant 1.000000e+00 : f32
    %152 = vector.broadcast %cst_36 : f32 to vector<8x1xf32>
    %153 = arith.maximumf %131, %152 : vector<8x1xf32>
    %154 = vector.broadcast %153 : vector<8x1xf32> to vector<8x384xf32>
    %155 = arith.mulf %82, %154 : vector<8x384xf32>
    %cst_37 = arith.constant dense<0.000000e+00> : vector<384xf32>
    %156 = vector.multi_reduction <add>, %155, %cst_37 [0] : vector<8x384xf32> to vector<384xf32>
    %157 = vector.shape_cast %156 : vector<384xf32> to vector<1x384xf32>
    %158 = arith.subf %138, %25 : vector<1x384xf32>
    %159 = arith.divf %158, %21 : vector<1x384xf32>
    %cst_38 = arith.constant 1.000000e-01 : f32
    %160 = vector.broadcast %cst_38 : f32 to vector<1x384xf32>
    %161 = arith.divf %159, %160 : vector<1x384xf32>
    %162 = arith.subf %145, %28 : vector<1x384xf32>
    %163 = arith.divf %162, %22 : vector<1x384xf32>
    %cst_39 = arith.constant 1.000000e-01 : f32
    %164 = vector.broadcast %cst_39 : f32 to vector<1x384xf32>
    %165 = arith.divf %163, %164 : vector<1x384xf32>
    %166 = arith.divf %151, %21 : vector<1x384xf32>
    %167 = math.log %166 : vector<1x384xf32>
    %cst_40 = arith.constant 2.000000e-01 : f32
    %168 = vector.broadcast %cst_40 : f32 to vector<1x384xf32>
    %169 = arith.divf %167, %168 : vector<1x384xf32>
    %170 = arith.divf %157, %22 : vector<1x384xf32>
    %171 = math.log %170 : vector<1x384xf32>
    %cst_41 = arith.constant 2.000000e-01 : f32
    %172 = vector.broadcast %cst_41 : f32 to vector<1x384xf32>
    %173 = arith.divf %171, %172 : vector<1x384xf32>
    %174 = vector.extract_strided_slice %10 {offsets = [0, 0], sizes = [1, 384], strides = [1, 1]} : vector<4x384xf32> to vector<1x384xf32>
    %175 = arith.subf %161, %174 : vector<1x384xf32>
    %176 = math.absf %175 : vector<1x384xf32>
    %cst_42 = arith.constant 0.111111112 : f32
    %177 = vector.broadcast %cst_42 : f32 to vector<1x384xf32>
    %178 = arith.cmpf ole, %176, %177 : vector<1x384xf32>
    %cst_43 = arith.constant 4.500000e+00 : f32
    %179 = vector.broadcast %cst_43 : f32 to vector<1x384xf32>
    %180 = arith.mulf %179, %176 : vector<1x384xf32>
    %181 = arith.mulf %180, %176 : vector<1x384xf32>
    %cst_44 = arith.constant 0.055555556 : f32
    %182 = vector.broadcast %cst_44 : f32 to vector<1x384xf32>
    %183 = arith.subf %176, %182 : vector<1x384xf32>
    %184 = arith.select %178, %181, %183 : vector<1x384xi1>, vector<1x384xf32>
    %185 = vector.extract_strided_slice %10 {offsets = [1, 0], sizes = [1, 384], strides = [1, 1]} : vector<4x384xf32> to vector<1x384xf32>
    %186 = arith.subf %165, %185 : vector<1x384xf32>
    %187 = math.absf %186 : vector<1x384xf32>
    %cst_45 = arith.constant 0.111111112 : f32
    %188 = vector.broadcast %cst_45 : f32 to vector<1x384xf32>
    %189 = arith.cmpf ole, %187, %188 : vector<1x384xf32>
    %cst_46 = arith.constant 4.500000e+00 : f32
    %190 = vector.broadcast %cst_46 : f32 to vector<1x384xf32>
    %191 = arith.mulf %190, %187 : vector<1x384xf32>
    %192 = arith.mulf %191, %187 : vector<1x384xf32>
    %cst_47 = arith.constant 0.055555556 : f32
    %193 = vector.broadcast %cst_47 : f32 to vector<1x384xf32>
    %194 = arith.subf %187, %193 : vector<1x384xf32>
    %195 = arith.select %189, %192, %194 : vector<1x384xi1>, vector<1x384xf32>
    %196 = arith.addf %184, %195 : vector<1x384xf32>
    %197 = vector.extract_strided_slice %10 {offsets = [2, 0], sizes = [1, 384], strides = [1, 1]} : vector<4x384xf32> to vector<1x384xf32>
    %198 = arith.subf %169, %197 : vector<1x384xf32>
    %199 = math.absf %198 : vector<1x384xf32>
    %cst_48 = arith.constant 0.111111112 : f32
    %200 = vector.broadcast %cst_48 : f32 to vector<1x384xf32>
    %201 = arith.cmpf ole, %199, %200 : vector<1x384xf32>
    %cst_49 = arith.constant 4.500000e+00 : f32
    %202 = vector.broadcast %cst_49 : f32 to vector<1x384xf32>
    %203 = arith.mulf %202, %199 : vector<1x384xf32>
    %204 = arith.mulf %203, %199 : vector<1x384xf32>
    %cst_50 = arith.constant 0.055555556 : f32
    %205 = vector.broadcast %cst_50 : f32 to vector<1x384xf32>
    %206 = arith.subf %199, %205 : vector<1x384xf32>
    %207 = arith.select %201, %204, %206 : vector<1x384xi1>, vector<1x384xf32>
    %208 = arith.addf %196, %207 : vector<1x384xf32>
    %209 = vector.extract_strided_slice %10 {offsets = [3, 0], sizes = [1, 384], strides = [1, 1]} : vector<4x384xf32> to vector<1x384xf32>
    %210 = arith.subf %173, %209 : vector<1x384xf32>
    %211 = math.absf %210 : vector<1x384xf32>
    %cst_51 = arith.constant 0.111111112 : f32
    %212 = vector.broadcast %cst_51 : f32 to vector<1x384xf32>
    %213 = arith.cmpf ole, %211, %212 : vector<1x384xf32>
    %cst_52 = arith.constant 4.500000e+00 : f32
    %214 = vector.broadcast %cst_52 : f32 to vector<1x384xf32>
    %215 = arith.mulf %214, %211 : vector<1x384xf32>
    %216 = arith.mulf %215, %211 : vector<1x384xf32>
    %cst_53 = arith.constant 0.055555556 : f32
    %217 = vector.broadcast %cst_53 : f32 to vector<1x384xf32>
    %218 = arith.subf %211, %217 : vector<1x384xf32>
    %219 = arith.select %213, %216, %218 : vector<1x384xi1>, vector<1x384xf32>
    %220 = arith.addf %208, %219 : vector<1x384xf32>
    %221 = arith.mulf %220, %96 : vector<1x384xf32>
    %c0_54 = arith.constant 0 : index
    %c0_55 = arith.constant 0 : index
    %222 = vector.load %arg7[%c0_54, %c0_55] : memref<1x384xf32, #tpu.memory_space<vmem>>, vector<1x384xf32>
    %223 = arith.addf %222, %129 : vector<1x384xf32>
    %c0_56 = arith.constant 0 : index
    %c0_57 = arith.constant 0 : index
    %224 = vector.load %arg7[%c0_56, %c0_57] : memref<1x384xf32, #tpu.memory_space<vmem>>, vector<1x384xf32>
    tpu.vector_store %arg7[%c0_56, %c0_57], %223 {strides = array<i32>} : memref<1x384xf32, #tpu.memory_space<vmem>>, vector<1x384xf32>,
    %c0_58 = arith.constant 0 : index
    %c0_59 = arith.constant 0 : index
    %225 = vector.load %arg8[%c0_58, %c0_59] : memref<1x384xf32, #tpu.memory_space<vmem>>, vector<1x384xf32>
    %226 = arith.addf %225, %96 : vector<1x384xf32>
    %c0_60 = arith.constant 0 : index
    %c0_61 = arith.constant 0 : index
    %227 = vector.load %arg8[%c0_60, %c0_61] : memref<1x384xf32, #tpu.memory_space<vmem>>, vector<1x384xf32>
    tpu.vector_store %arg8[%c0_60, %c0_61], %226 {strides = array<i32>} : memref<1x384xf32, #tpu.memory_space<vmem>>, vector<1x384xf32>,
    %c0_62 = arith.constant 0 : index
    %c0_63 = arith.constant 0 : index
    %228 = vector.load %arg9[%c0_62, %c0_63] : memref<1x384xf32, #tpu.memory_space<vmem>>, vector<1x384xf32>
    %229 = arith.addf %228, %221 : vector<1x384xf32>
    %c0_64 = arith.constant 0 : index
    %c0_65 = arith.constant 0 : index
    %230 = vector.load %arg9[%c0_64, %c0_65] : memref<1x384xf32, #tpu.memory_space<vmem>>, vector<1x384xf32>
    tpu.vector_store %arg9[%c0_64, %c0_65], %229 {strides = array<i32>} : memref<1x384xf32, #tpu.memory_space<vmem>>, vector<1x384xf32>,
    %c0_i32_66 = arith.constant 0 : i32
    %231 = arith.cmpi eq, %arg1, %c0_i32_66 : i32
    %232 = arith.extui %231 : i1 to i32
    %c0_i32_67 = arith.constant 0 : i32
    %233 = arith.cmpi ne, %232, %c0_i32_67 : i32
    scf.if %233 {
      %c0_68 = arith.constant 0 : index
      %c0_69 = arith.constant 0 : index
      %234 = vector.load %arg7[%c0_68, %c0_69] : memref<1x384xf32, #tpu.memory_space<vmem>>, vector<1x384xf32>
      %235 = vector.shape_cast %234 : vector<1x384xf32> to vector<1x1x384xf32>
      %cst_70 = arith.constant dense<0.000000e+00> : vector<1xf32>
      %236 = vector.multi_reduction <add>, %235, %cst_70 [1, 2] : vector<1x1x384xf32> to vector<1xf32>
      %237 = vector.shape_cast %236 : vector<1xf32> to vector<1x1x1xf32>
      %238 = vector.extract %237[0, 0, 0] : f32 from vector<1x1x1xf32>
      %c0_71 = arith.constant 0 : index
      %c0_72 = arith.constant 0 : index
      %239 = vector.load %arg8[%c0_71, %c0_72] : memref<1x384xf32, #tpu.memory_space<vmem>>, vector<1x384xf32>
      %240 = vector.shape_cast %239 : vector<1x384xf32> to vector<1x1x384xf32>
      %cst_73 = arith.constant dense<0.000000e+00> : vector<1xf32>
      %241 = vector.multi_reduction <add>, %240, %cst_73 [1, 2] : vector<1x1x384xf32> to vector<1xf32>
      %242 = vector.shape_cast %241 : vector<1xf32> to vector<1x1x1xf32>
      %243 = vector.extract %242[0, 0, 0] : f32 from vector<1x1x1xf32>
      %c0_74 = arith.constant 0 : index
      %c0_75 = arith.constant 0 : index
      %244 = vector.load %arg9[%c0_74, %c0_75] : memref<1x384xf32, #tpu.memory_space<vmem>>, vector<1x384xf32>
      %245 = vector.shape_cast %244 : vector<1x384xf32> to vector<1x1x384xf32>
      %cst_76 = arith.constant dense<0.000000e+00> : vector<1xf32>
      %246 = vector.multi_reduction <add>, %245, %cst_76 [1, 2] : vector<1x1x384xf32> to vector<1xf32>
      %247 = vector.shape_cast %246 : vector<1xf32> to vector<1x1x1xf32>
      %248 = vector.extract %247[0, 0, 0] : f32 from vector<1x1x1xf32>
      %249 = tpu.iota {dimensions = array<i32: 2>} : vector<1x1x128xi32>
      %c0_i32_77 = arith.constant 0 : i32
      %250 = vector.broadcast %c0_i32_77 : i32 to vector<1x1x128xi32>
      %251 = arith.cmpi eq, %249, %250 : vector<1x1x128xi32>
      %c1_i32 = arith.constant 1 : i32
      %252 = vector.broadcast %c1_i32 : i32 to vector<1x1x128xi32>
      %253 = arith.cmpi eq, %249, %252 : vector<1x1x128xi32>
      %c2_i32 = arith.constant 2 : i32
      %254 = vector.broadcast %c2_i32 : i32 to vector<1x1x128xi32>
      %255 = arith.cmpi eq, %249, %254 : vector<1x1x128xi32>
      %cst_78 = arith.constant 0.000000e+00 : f32
      %256 = vector.broadcast %248 : f32 to vector<1x1x128xf32>
      %257 = vector.broadcast %cst_78 : f32 to vector<1x1x128xf32>
      %258 = arith.select %255, %256, %257 : vector<1x1x128xi1>, vector<1x1x128xf32>
      %259 = vector.broadcast %243 : f32 to vector<1x1x128xf32>
      %260 = arith.select %253, %259, %258 : vector<1x1x128xi1>, vector<1x1x128xf32>
      %261 = vector.broadcast %238 : f32 to vector<1x1x128xf32>
      %262 = arith.select %251, %261, %260 : vector<1x1x128xi1>, vector<1x1x128xf32>
      %c0_79 = arith.constant 0 : index
      %c0_80 = arith.constant 0 : index
      %c0_81 = arith.constant 0 : index
      %263 = vector.load %arg6[%c0_79, %c0_80, %c0_81] : memref<1x1x128xf32, #tpu.memory_space<vmem>>, vector<1x1x128xf32>
      tpu.vector_store %arg6[%c0_79, %c0_80, %c0_81], %262 {strides = array<i32>} : memref<1x1x128xf32, #tpu.memory_space<vmem>>, vector<1x1x128xf32>,
    } else {
    }
    return
  }
  func.func @transform_0(%arg0: i32, %arg1: i32) -> (i32, i32, i32) {
    %c0_i32 = arith.constant 0 : i32
    %c0_i32_0 = arith.constant 0 : i32
    return %arg0, %c0_i32, %arg1 : i32, i32, i32
  }
  func.func @transform_1(%arg0: i32, %arg1: i32) -> (i32, i32, i32) {
    %c0_i32 = arith.constant 0 : i32
    %c0_i32_0 = arith.constant 0 : i32
    return %arg0, %c0_i32, %arg1 : i32, i32, i32
  }
  func.func @transform_2(%arg0: i32, %arg1: i32) -> (i32, i32) {
    %c0_i32 = arith.constant 0 : i32
    %c0_i32_0 = arith.constant 0 : i32
    %c0_i32_1 = arith.constant 0 : i32
    return %c0_i32, %c0_i32_0 : i32, i32
  }
  func.func @transform_3(%arg0: i32, %arg1: i32) -> (i32, i32, i32) {
    %c0_i32 = arith.constant 0 : i32
    %c0_i32_0 = arith.constant 0 : i32
    %c0_i32_1 = arith.constant 0 : i32
    return %arg0, %c0_i32, %c0_i32_0 : i32, i32, i32
  }
  func.func @transform_4(%arg0: i32, %arg1: i32) -> (i32, i32, i32) {
    %c0_i32 = arith.constant 0 : i32
    %c0_i32_0 = arith.constant 0 : i32
    %c0_i32_1 = arith.constant 0 : i32
    return %arg0, %c0_i32, %c0_i32_0 : i32, i32, i32
  }
}

</mosaic_0001>

<bundles_post_ra>
// kernel: tpu_custom_call.1
= control target key start
LH: loop header
LB: loop body
LE: loop exit
PB: predicated region body
PF: predicated region fallthrough
CT: control target
= control target key end

     0   :  { %9 = vsyncpa [#allocation6], 0  ;;  %s2581_s0 = inlined_call_operand.hbm [shape: f32[2,8,384], index: 0, kind: input, shape index: {}]   ;;  %s2582_s1 = inlined_call_operand.vmem [shape: f32[2,4,384], index: 1, kind: input, shape index: {}]   ;;  %s2583_s2 = inlined_call_operand.hbm [shape: f32[4,384], index: 2, kind: input, shape index: {}]   ;;  %s2584_s3 = inlined_call_operand.vmem [shape: f32[2,8,5], index: 3, kind: input, shape index: {}]   ;;  %s2585_s4 = inlined_call_operand.hbm [shape: f32[2,1,128], index: 4, kind: output, shape index: {}]  }
   0x1   :  { %11 = vsyncpa [#allocation6 + $0x1], 0 }
   0x2   :  { %12 = vsyncpa [#allocation9], 0 }
   0x3   :  { %13 = vsyncpa [#allocation7], 0 }
   0x4   :  { %15 = vsyncpa [#allocation7 + $0x1], 0  ;;  %s1754_s15 = smov 0   ;;  %s1756_s16 = smov 0  }
   0x5   :  { %s1758_s17 = smov 0   ;;  %s1760_s18 = smov 0  }
   0x6   :  { %s1762_s19 = smov 0   ;;  %s1764_s20 = smov 0  }
   0x7 LB: > { %s1373_s21 = sadd.s32 4294967295, %s1714_s20   ;;  %s1374_s22 = sadd.s32 4294967294, %s1714_s20   ;;  %s1714_s20 = sphi %s1764_s20, %s21_s20   ;;  %s1710_s19 = sphi %s1762_s19, %s2684_s19   ;;  %s1706_s18 = sphi %s1760_s18, %s2683_s18   ;;  %s1702_s17 = sphi %s1758_s17, %s2682_s17   ;;  %s1698_s16 = sphi %s1756_s16, %s2681_s16   ;;  %s1694_s15 = sphi %s1754_s15, %s2680_s15  }
   0x8   : > { %p55_p0 = scmp.ne.s32.totalorder %s1698_s16, %s1694_s15  ;;  %p1788_p1 = scmp.eq.s32.totalorder %s1373_s21, 0 }
   0x9   : > { %p1792_p2 = scmp.eq.s32.totalorder %s1373_s21, 1  ;;  %p160_p3 = scmp.eq.s32.totalorder %s1374_s22, 1 }
   0xa   : > { %p1798_p4 = por %p1788_p1, %p55_p0  ;;  %p1375_p5 = scmp.ge.s32.totalorder %s1714_s20, 1 }
   0xb   : > { %p1803_p6 = por %p160_p3, %p55_p0  ;;  %p167_p7 = scmp.lt.s32.totalorder %s1714_s20, 3 }
   0xc   : > { %s179_s29 = sshll.u32 %s2583_s2, 4  ;;  %s1716_s5 = smov [#allocation8]   ;;  %s180_s29 = int_to_ptr.hbm [resolvable:$true] %s179_s29 }
   0xd   : > { %p1811_p8 = pnand %p1375_p5, %p167_p7  ;;  %s181_s6 = sshll.u32 %s1716_s5, 4  ;;  %s182_s6 = int_to_ptr.vmem [resolvable:$true] %s181_s6 }
   0xe   : > { %s33_s7 = sadd.s32 1, %s1710_s19  ;;  %s42_s8 = sadd.s32 1, %s1702_s17 }
   0xf   : > { %p1441_p10 = pneg %p1811_p8  ;;  %p35_p12 = scmp.ge.s32.totalorder %s33_s7, 2 }
  0x10   : > { %p49_p13 = scmp.ne.s32.totalorder %s1702_s17, %s1698_s16  ;;  %p50_p0 = scmp.eq.s32.totalorder %s1714_s20, 0 }
  0x11   : > { %p1442_p11 = pnand %p1441_p10, %p1788_p1  ;;  %s2686_s7 = smov (%p35_p12, %s33_s7), 0 }
  0x12   : > { %p51_p3 = por %p50_p0, %p49_p13  ;;  %p1829_p5 = por %p1792_p2, %p49_p13 }
  0x13   : > { %1444 = dma.hbm_to_vmem [thread:$0]  (!%p1442_p11), %s180_s29, 192, %s182_s6, [#allocation9]  }
  0x14   : > { %s37_s10 = ssub.s32 %s1710_s19, %s2686_s7  ;;  %p1454_p7 = scmp.lt.s32.totalorder %s1714_s20, 2 }
  0x15   : > { %p40_p9 = scmp.eq.s32.totalorder %s37_s10, 0  ;;  %s192_s11 = sand.u32 1, %s1702_s17  }
  0x16   : > { %s1408_s12 = smul.u32 24, %s192_s11  ;;  %p1446_p10 = pnand %p1454_p7, %p51_p3 }
  0x17   : > { %s1838_s13 = scalar_select %p40_p9, %s1702_s17, %s42_s8  }
  0x18   : > { %s1409_s14 = smul.u32 24, %s1710_s19  ;;  %s196_s21 = scalar_lea.vmem [#allocation5], %s1408_s12 }
  0x19   : > { %s207_s22 = sshll.u32 %s196_s21, 4  ;;  %s193_s5 = scalar_lea.sflag [#allocation6], %s192_s11  ;;  %s208_s22 = int_to_ptr.vmem [resolvable:$true] %s207_s22 }
  0x1a   : > { %s203_s29 = scalar_lea.hbm %s2581_s0, %s1409_s14  ;;  %236 = sbr.rel (%p1811_p8) target bundleno = 757 (0x2f5), region = 36 }
  0x1b   : > { %s205_s24 = sshll.u32 %s203_s29, 4  ;;  %s206_s24 = int_to_ptr.hbm [resolvable:$true] %s205_s24 }
  0x1c   : > { %1448 = dma.hbm_to_vmem [thread:$0]  (!%p1446_p10), %s206_s24, 384, %s208_s22, %s193_s5  }
  0x1f   : > { %s1847_s6 = sand.u32 1, %s1698_s16  }
  0x20   : > { %s1410_s8 = smul.u32 24, %s1847_s6  ;;  %s239_s10 = scalar_lea.sflag [#allocation6], %s1847_s6 }
  0x22   : > { %s1851_s12 = scalar_lea.vmem [#allocation5], %s1410_s8 }
  0x23   : > { %1681 = dma.done.wait (%p1798_p4), %s239_s10, 384  }
  0x24   : > { %1683 = vsyncadd (%p1798_p4), %s239_s10, 4294966912 }
  0x25   : > { %1685 = dma.done.wait (%p1788_p1), [#allocation9], 192  }
  0x26   : > { %1687 = vsyncadd (%p1788_p1), [#allocation9], 4294967104  ;;  %p287_p2 = scmp.lt.s32.totalorder %s1706_s18, 1  ;;  %v1717_v0 = vmov 3   ;;  %s1718_s22 = smov 2   ;;  %v1719_v2 = vmov 1   ;;  %v304_v17 = vlaneseq }
  0x27   : > { %1520 = vset.pattern.permute.xlu2 %v1717_v0  ;;  %v1720_v3 = vmov 2   ;;  %v1721_v4 = vmov 0   ;;  %v1722_v6 = vmov 4   ;;  %s1723_s23 = smov 127   ;;  %s1724_s27 = smov 126   ;;  %v2589_v19 = vmov 0.0  }
  0x28   : > { %s1863_s30 = scalar_select %p287_p2, %s1706_s18, 1  ;;  %1518 = vset.pattern.permute.xlu1 %v1720_v3  ;;  %1522 = vset.pattern.permute.xlu0 %v1720_v3  ;;  %vm1874_vm1 = vcmp.lt.s32.totalorder %v304_v17, 384  ;;  %v1887_v20 = vld [vmem:[#allocation8] sm:$0xff]  ;;  %v1889_v22 = vld [vmem:[#allocation8 + $0x8] sm:$0xf] }
  0x29   : > { %308 = vst.msk [vmem:[#allocation2] sm:$0x7] %vm1874_vm1, %v2589_v19  ;;  %v333_v23 = vrot.slane %v1887_v20, 6  ;;  %v334_v24 = vrot.slane %v1889_v22, 6  ;;  %v391_v25 = vperm.slane %v1887_v20, 3  ;;  %v392_v26 = vperm.slane %v1887_v20, 7  ;;  %s1250_s14 = scalar_lea.hbm %s2585_s4, %s1706_s18 }
  0x2a   : > { %s1382_s11 = sshll.u32 %s1863_s30, 3  ;;  %309 = vst.msk [vmem:[#allocation3] sm:$0x7] %vm1874_vm1, %v2589_v19  ;;  %v393_v27 = vperm.slane %v1889_v22, 3  ;;  %v407_v28 = vperm.slane %v1887_v20, 1  ;;  %v408_v29 = vperm.slane %v1887_v20, 5 }
  0x2b   : > { %s299_s25 = scalar_lea.vmem %s2584_s3, %s1382_s11  ;;  %310 = vst.msk [vmem:[#allocation4] sm:$0x7] %vm1874_vm1, %v2589_v19  ;;  %v409_v30 = vperm.slane %v1889_v22, 1  ;;  %v352_v31 = vperm.slane %v1887_v20, 2  ;;  %v353_v32 = vperm.slane %v1887_v20, 6  ;;  %v369_v33 = vperm.slane %v1887_v20, 0 }
  0x2c   : > { %v323_v1 = vld [vmem:[%s299_s25] sm:$0xff]  ;;  %v370_v34 = vperm.slane %v1887_v20, 4  ;;  %v354_v35 = vperm.slane %v1889_v22, 2  ;;  %v371_v36 = vperm.slane %v1889_v22, 0  ;;  %v1906_v37 = vsub.f32 %v1887_v20, %v333_v23  ;;  %s1411_s28 = smul.u32 12, %s1863_s30  ;;  %s2534_s8 = scalar_lea.vmem [#allocation10], %s1847_s6 }
  0x2d   : > { %442 = vrot.lane.b32.xlu0 %v323_v1, %s1718_s22  ;;  %401 = vperm.xlu2 %1520, %v323_v1   ;;  %vm351_vm0 = vcmp.ne.f32.partialorder %v323_v1, -1.0  ;;  %v1909_v38 = vsub.f32 %v1889_v22, %v334_v24  ;;  %v397_v39 = vperm.slane %v391_v25, 3  ;;  %v398_v40 = vperm.slane %v392_v26, 3  ;;  %s1252_s21 = sshll.u32 %s2534_s8, 4  ;;  %s1254_s22 = sshll.u32 %s1250_s14, 4  ;;  %s1253_s21 = int_to_ptr.vmem [resolvable:$true] %s1252_s21  ;;  %s1255_s22 = int_to_ptr.hbm [resolvable:$true] %s1254_s22 }
  0x2e   : > { %363 = vperm.xlu1 %1518, %v323_v1   ;;  %v521_v5 = vsel %vm351_vm0, 1, %v1721_v4  ;;  %v399_v41 = vperm.slane %v393_v27, 3  ;;  %v413_v42 = vperm.slane %v407_v28, 1  ;;  %v414_v43 = vperm.slane %v408_v29, 1  ;;  %s294_s5 = scalar_lea.vmem %s2582_s1, %s1411_s28  ;;  %s1242_s18 = scalar_lea.sflag [#allocation7], %s1847_s6 }
  0x2f   : > { %v415_v44 = vperm.slane %v409_v30, 1  ;;  %v358_v45 = vperm.slane %v352_v31, 2  ;;  %v359_v46 = vperm.slane %v353_v32, 2  ;;  %v375_v47 = vperm.slane %v369_v33, 0  ;;  %s1648_s24 = scalar_lea.hbm %s2585_s4, 2 }
  0x30   : > { %v376_v48 = vperm.slane %v370_v34, 0  ;;  %v360_v49 = vperm.slane %v354_v35, 2  ;;  %v377_v50 = vperm.slane %v371_v36, 0  ;;  %v1385_v52 = vrot.slane %v1906_v37, 9 }
  0x31   : > { %v1386_v53 = vrot.slane %v1909_v38, 9 }
  0x35   : > { %1521 = vset.pattern.permute.xlu2 %v1719_v2 }
  0x36   : > { %417 = vperm.xlu2 %1521, %v323_v1   ;;  %1519 = vset.pattern.permute.xlu1 %v1721_v4 }
  0x37   : > { %379 = vperm.xlu1 %1519, %v323_v1  }
  0x3e   : > { %1524 = vset.pattern.permute.xlu2 %v1720_v3  ;;  %v441_v3 = vmul.f32 %v1386_v53, %v1909_v38 }
  0x3f   : > { %1523 = vset.pattern.permute.xlu1 %v1722_v6 }
  0x40   : > { %523 = vperm.xlu1 %1523, %v521_v5  }
  0x48   : > { %624 = vperm.xlu1 %1523, %v323_v1  }
  0x50   : > { %1526 = vset.pattern.permute.xlu1 %v1721_v4 }
  0x87   : > { %v1869_v11 = vpop.permute.xlu2 %401 }
  0x88   : > { %v404_v54 = vmin.f32 %v397_v39, %v1869_v11  ;;  %v405_v55 = vmin.f32 %v398_v40, %v1869_v11  ;;  %v406_v56 = vmin.f32 %v399_v41, %v1869_v11 }
  0x90   : > { %v1871_v12 = vpop.permute.xlu2 %417 }
  0x91   : > { %v420_v57 = vmax.f32 %v413_v42, %v1871_v12  ;;  %v421_v58 = vmax.f32 %v414_v43, %v1871_v12  ;;  %v422_v59 = vmax.f32 %v415_v44, %v1871_v12  ;;  %v1931_v42 = vand.u32 127, %v304_v17 }
  0x92   : > { %v1934_v43 = vperm.slane %v1909_v38, 2 }
  0x93   : > { %v423_v4 = vsub.f32 %v404_v54, %v420_v57  ;;  %v424_v5 = vsub.f32 %v405_v55, %v421_v58  ;;  %v425_v6 = vsub.f32 %v406_v56, %v422_v59  ;;  %2600 = vst [vmem:[#allocation14_spill] sm:$0xff] %v1931_v42  ;;  %v594_v44 = vadd.s32 256, %v1931_v42 }
  0x95   : > { %v426_v12 = vmax.f32 %v423_v4, 0.0  ;;  %vm601_vm3 = vcmp.lt.s32.totalorder %v594_v44, 300 }
  0x9f   : > { %v443_v7 = vpop.permute.xlu0 %442 }
  0xa0   : > { %v445_v8 = vsub.f32 %v323_v1, %v443_v7  ;;  %v364_v21 = vpop.permute.xlu1 %363 }
  0xa1   : > { %v366_v60 = vmin.f32 %v358_v45, %v364_v21  ;;  %v367_v61 = vmin.f32 %v359_v46, %v364_v21 }
  0xa2   : > { %447 = vrot.lane.b32.xlu0 %v445_v8, %s1723_s23  ;;  %v726_v9 = vmul.f32 0.5, %v445_v8  ;;  %v783_v10 = vmax.f32 %v445_v8, 1.0  ;;  %s1642_s23 = sshra.s32 %s1255_s22, 4  ;;  %s1643_s23 = int_to_ptr.hbm [resolvable:$true] %s1642_s23 }
  0xa3   : > { %p1649_p9 = scmp.lt.s32.totalorder %s1643_s23, %s2585_s4 }
  0xa4   : > { %728 = vrot.lane.b32.xlu2 %v726_v9, %s1724_s27  ;;  %s1644_s27 = scalar_lea.hbm %s1643_s23, 1 }
  0xa5   : > { %p1645_p1 = scmp.ne.s32.totalorder %s1643_s23, %s1644_s27  ;;  %p1650_p11 = scmp.lt.s32.totalorder %s1648_s24, %s1644_s27 }
  0xa7   : > { %p1646_p4 = pnand %p1645_p1, %p1829_p5  ;;  %p1651_p12 = por %p1650_p11, %p1649_p9 }
  0xa9   : > { %v380_v51 = vpop.permute.xlu1 %379  ;;  %p1647_p8 = pneg %p1646_p4 }
  0xaa   : > { %v382_v62 = vmax.f32 %v375_v47, %v380_v51  ;;  %v383_v63 = vmax.f32 %v376_v48, %v380_v51 }
  0xab   : > { %p1652_p13 = pnand %p1651_p12, %p1647_p8 }
  0xac   : > { %786 = vperm.xlu2 %1524, %v783_v10   ;;  %v385_v7 = vsub.f32 %v366_v60, %v382_v62 }
  0xb4   : > { %1527 = vset.pattern.permute.xlu2 %v1719_v2  ;;  %v440_v2 = vmul.f32 %v1385_v52, %v1906_v37 }
  0xb6   : > { %v454_v11 = vperm.slane %v440_v2, 6 }
  0xb8   : > { %v460_v25 = vperm.slane %v454_v11, 2 }
  0xfe   : > { %v729_v13 = vpop.permute.xlu2 %728 }
  0xff   : > { %v731_v14 = vadd.f32 %v729_v13, %v323_v1  ;;  %v384_v1 = vmax.f32 %v377_v50, %v380_v51  ;;  %v455_v13 = vperm.slane %v441_v3, 2 }
 0x101   : > { %759 = vperm.xlu2 %1527, %v731_v14   ;;  %734 = vperm.xlu1 %1526, %v731_v14   ;;  %v427_v14 = vmax.f32 %v424_v5, 0.0  ;;  %v461_v26 = vperm.slane %v455_v13, 2  ;;  %v340_v5 = vmul.f32 0.5, %v1909_v38 }
 0x114   : > { %v448_v15 = vpop.permute.xlu0 %447 }
 0x115   : > { %v450_v16 = vmul.f32 %v448_v15, %v445_v8  ;;  %v386_v8 = vsub.f32 %v367_v61, %v383_v63  ;;  %v428_v15 = vmax.f32 %v425_v6, 0.0  ;;  %v1947_v6 = vperm.slane %v1906_v37, 2 }
 0x117   : > { %464 = vperm.xlu0 %1522, %v450_v16   ;;  %v388_v16 = vmax.f32 %v385_v7, 0.0  ;;  %v389_v23 = vmax.f32 %v386_v8, 0.0  ;;  %vm857_vm0 = vweird.f32 %v1947_v6 }
 0x119   : > { %v1921_v27 = vmul.f32 %v426_v12, %v388_v16  ;;  %v1923_v28 = vmul.f32 %v427_v14, %v389_v23  ;;  %v1961_v16 = vperm.slane %v1906_v37, 6 }
 0x11f   : > { %1525 = vset.pattern.permute.xlu0 %v1717_v0  ;;  %v368_v0 = vmin.f32 %v360_v49, %v364_v21  ;;  %v524_v49 = vpop.permute.xlu1 %523 }
 0x120   : > { %811 = vperm.xlu0 %1525, %v783_v10   ;;  %v453_v10 = vperm.slane %v440_v2, 2  ;;  %vm525_vm2 = vcmp.eq.s32.totalorder %v524_v49, 1 }
 0x121   : > { %v387_v9 = vsub.f32 %v368_v0, %v384_v1  ;;  %v339_v1 = vmul.f32 0.5, %v1906_v37 }
 0x122   : > { %v459_v24 = vperm.slane %v453_v10, 2 }
 0x123   : > { %v390_v21 = vmax.f32 %v387_v9, 0.0 }
 0x125   : > { %v1925_v30 = vmul.f32 %v428_v15, %v390_v21  ;;  %v1383_v15 = vrot.slane %v339_v1, 10 }
 0x189   : > { %v465_v29 = vpop.permute.xlu0 %464 }
 0x18a   : > { %v467_v31 = vadd.f32 %v465_v29, %v459_v24  ;;  %v468_v32 = vadd.f32 %v465_v29, %v460_v25  ;;  %v469_v33 = vadd.f32 %v465_v29, %v461_v26  ;;  %v1384_v25 = vrot.slane %v340_v5, 10 }
 0x18c   : > { %v470_v34 = vsub.f32 %v467_v31, %v1921_v27  ;;  %v471_v35 = vsub.f32 %v468_v32, %v1923_v28  ;;  %v472_v36 = vsub.f32 %v469_v33, %v1925_v30  ;;  %v1968_v31 = vshrl.u32 %v304_v17, 7 }
 0x18d   : > { %v1972_v32 = vsel %vm601_vm3, 1.0, %v2589_v19 }
 0x18e   : > { %v473_v39 = vmax.f32 %v470_v34, 1e-08  ;;  %v474_v40 = vmax.f32 %v471_v35, 1e-08  ;;  %v475_v41 = vmax.f32 %v472_v36, 1e-08 }
 0x190   : > { %1528 = vrcp.f32 %v473_v39  ;;  %v485_v45 = vand.u32 2147483647, %v473_v39  ;;  %v487_v47 = vand.u32 2147483648, %v473_v39  ;;  %vm481_vm4 = vweird.f32 %v473_v39 }
 0x191   : > { %1530 = vrcp.f32 %v474_v40  ;;  %vm496_vm5 = vweird.f32 %v474_v40  ;;  %v500_v53 = vand.u32 2147483647, %v474_v40  ;;  %v502_v56 = vand.u32 2147483648, %v474_v40 }
 0x192   : > { %1532 = vrcp.f32 %v475_v41  ;;  %vm1938_vm6 = vcmp.eq.f32.partialorder %v485_v45, 8.507059e+37  ;;  %v488_v58 = vor.u32 1.1754944e-38, %v487_v47  ;;  %vm511_vm7 = vweird.f32 %v475_v41 }
 0x193   : > { %1534 = vrcp.f32 %v1934_v43  ;;  %v515_v60 = vand.u32 2147483647, %v475_v41  ;;  %v517_v63 = vand.u32 2147483648, %v475_v41  ;;  %vm501_vm12 = vcmp.eq.f32.partialorder %v500_v53, 8.507059e+37 }
 0x194   : > { %v503_v8 = vor.u32 1.1754944e-38, %v502_v56  ;;  %1536 = vrcp.f32 %v1947_v6  ;;  %v861_v47 = vand.u32 2147483647, %v1947_v6 }
 0x195   : > { %vm1950_vm13 = vcmp.eq.f32.partialorder %v515_v60, 8.507059e+37  ;;  %v518_v13 = vor.u32 1.1754944e-38, %v517_v63  ;;  %1538 = vrcp.f32 %v1961_v16 }
 0x196   : > { %v1529_v46 = vpop.eup %1528 }
 0x197   : > { %v1531_v48 = vpop.eup %1530  ;;  %v477_v50 = vmul.f32 %v1529_v46, %v473_v39  ;;  %vm482_vm8 = vweird.f32 %v1529_v46  ;;  %v1987_v39 = vadd.f32 %v1383_v15, %v1887_v20  ;;  %v863_v20 = vand.u32 2147483648, %v1947_v6 }
 0x198   : > { %v1533_v51 = vpop.eup %1532  ;;  %v492_v52 = vmul.f32 %v1531_v48, %v474_v40  ;;  %vm497_vm9 = vweird.f32 %v1531_v48  ;;  %vm483_vm11 = vmor %vm481_vm4, %vm482_vm8 }
 0x199   : > { %v478_v54 = vsub.f32 1.0, %v477_v50  ;;  %v507_v57 = vmul.f32 %v1533_v51, %v475_v41  ;;  %vm512_vm10 = vweird.f32 %v1533_v51  ;;  %v1943_v2 = vpop.eup %1534  ;;  %vm498_vm14 = vmor %vm496_vm5, %vm497_vm9  ;;  %v878_v50 = vand.u32 2147483648, %v1961_v16 }
 0x19a   : > { %v493_v59 = vsub.f32 1.0, %v492_v52  ;;  %vm513_vm15 = vmor %vm511_vm7, %vm512_vm10  ;;  %v883_v45 = vmul.f32 %v1943_v2, %v1934_v43  ;;  %v864_v1 = vor.u32 1.1754944e-38, %v863_v20  ;;  %vm2016_vm5 = vcmp.eq.f32.partialorder %v861_v47, 8.507059e+37 }
 0x19b   : > { %v479_v61 = vmul.f32 %v1529_v46, %v478_v54  ;;  %v508_v62 = vsub.f32 1.0, %v507_v57  ;;  %vm888_vm7 = vweird.f32 %v1943_v2 }
 0x19c   : > { %v494_v0 = vmul.f32 %v1531_v48, %v493_v59  ;;  %v884_v59 = vsub.f32 1.0, %v883_v45 }
 0x19d   : > { %v480_v3 = vadd.f32 %v1529_v46, %v479_v61  ;;  %v509_v4 = vmul.f32 %v1533_v51, %v508_v62 }
 0x19e   : > { %v495_v7 = vadd.f32 %v1531_v48, %v494_v0 }
 0x19f   : > { %v484_v10 = vsel %vm483_vm11, %v1529_v46, %v480_v3  ;;  %v510_v11 = vadd.f32 %v1533_v51, %v509_v4  ;;  %v2014_v3 = vor.u32 1.1754944e-38, %v878_v50 }
 0x1a0   : > { %v489_v12 = vsel %vm1938_vm6, %v488_v58, %v484_v10  ;;  %v499_v14 = vsel %vm498_vm14, %v1531_v48, %v495_v7  ;;  %v876_v58 = vand.u32 2147483647, %v1961_v16  ;;  %vm887_vm6 = vweird.f32 %v1934_v43 }
 0x1a1   : > { %v490_v23 = vmul.f32 %v489_v12, %v1921_v27  ;;  %v504_v21 = vsel %vm501_vm12, %v503_v8, %v499_v14  ;;  %v514_v24 = vsel %vm513_vm15, %v1533_v51, %v510_v11  ;;  %v885_v10 = vmul.f32 %v1943_v2, %v884_v59 }
 0x1a2   : > { %v505_v26 = vmul.f32 %v504_v21, %v1923_v28  ;;  %v519_v29 = vsel %vm1950_vm13, %v518_v13, %v514_v24  ;;  %v1980_v28 = vpop.eup %1536  ;;  %v891_v14 = vand.u32 2147483647, %v1934_v43  ;;  %vm2044_vm14 = vcmp.eq.f32.partialorder %v876_v58, 8.507059e+37 }
 0x1a3   : > { %v520_v33 = vmul.f32 %v519_v29, %v1925_v30  ;;  %v526_v34 = vsel %vm525_vm2, %v490_v23, -1.0  ;;  %v1990_v30 = vadd.f32 %v1384_v25, %v1889_v22  ;;  %v853_v44 = vmul.f32 %v1980_v28, %v1947_v6  ;;  %v2006_v55 = vpop.eup %1538 }
 0x1a4   : > { %v1977_v27 = vsel %vm525_vm2, %v505_v26, -1.0  ;;  %v529_v35 = vrot.slane %v526_v34, 4  ;;  %vm858_vm3 = vweird.f32 %v1980_v28  ;;  %v868_v62 = vmul.f32 %v2006_v55, %v1961_v16 }
 0x1a5   : > { %v1983_v36 = vsel %vm525_vm2, %v520_v33, -1.0  ;;  %v535_v17 = vrot.slane %v1977_v27, 4  ;;  %v854_v49 = vsub.f32 1.0, %v853_v44  ;;  %vm873_vm9 = vweird.f32 %v2006_v55  ;;  %vm2040_vm13 = vmor %vm857_vm0, %vm858_vm3 }
 0x1a6   : > { %v530_v40 = vmax.f32 %v526_v34, %v529_v35  ;;  %v541_v41 = vrot.slane %v1983_v36, 4  ;;  %v869_v7 = vsub.f32 1.0, %v868_v62  ;;  %v893_v29 = vand.u32 2147483648, %v1934_v43 }
 0x1a7   : > { %v536_v46 = vmax.f32 %v1977_v27, %v535_v17  ;;  %v855_v61 = vmul.f32 %v1980_v28, %v854_v49  ;;  %v1140_v49 = vld [vmem:[#allocation3] sm:$0x7]  ;;  %v2157_v62 = vperm.slane %v1906_v37, 7  ;;  %v2659_v26 = vperm.slane %v1987_v39, 4 }
 0x1a8   : > { %v531_v48 = vrot.slane %v530_v40, 2  ;;  %v542_v22 = vmax.f32 %v1983_v36, %v541_v41  ;;  %v870_v12 = vmul.f32 %v2006_v55, %v869_v7  ;;  %v2660_v43 = vperm.slane %v1990_v30, 0 }
 0x1a9   : > { %v537_v51 = vrot.slane %v536_v46, 2  ;;  %v856_v13 = vadd.f32 %v1980_v28, %v855_v61  ;;  %v946_v21 = vand.u32 2147483647, %v2157_v62 }
 0x1aa   : > { %v532_v56 = vmax.f32 %v530_v40, %v531_v48  ;;  %v543_v57 = vrot.slane %v542_v22, 2  ;;  %v871_v47 = vadd.f32 %v2006_v55, %v870_v12 }
 0x1ab   : > { %v538_v60 = vmax.f32 %v536_v46, %v537_v51  ;;  %v860_v41 = vsel %vm2040_vm13, %v1980_v28, %v856_v13  ;;  %vm2624_vm13 = vcmask 1040384  }
 0x1ac   : > { %v533_v63 = vrot.slane %v532_v56, 1  ;;  %v544_v0 = vmax.f32 %v542_v22, %v543_v57  ;;  %v894_v22 = vor.u32 1.1754944e-38, %v893_v29  ;;  %v2142_v58 = vsel %vm2016_vm5, %v864_v1, %v860_v41 }
 0x1ad   : > { %v539_v4 = vrot.slane %v538_v60, 1  ;;  %v1727_v29 = vmov 0.2  }
 0x1ae   : > { %v2022_v8 = vmax.f32 %v532_v56, %v533_v63  ;;  %v545_v9 = vrot.slane %v544_v0, 1  ;;  %v1726_v56 = vmov 0.1   ;;  %v2160_v63 = vperm.slane %v1909_v38, 3 }
 0x1af   : > { %v2026_v11 = vmax.f32 %v538_v60, %v539_v4  ;;  %1540 = vrcp.f32 %v1726_v56  ;;  %v2148_v60 = vperm.slane %v1906_v37, 3  ;;  %v312_v4 = vld [vmem:[%s1851_s12] sm:$0xff] }
 0x1b0   : > { %v2031_v15 = vmax.f32 %v544_v0, %v545_v9  ;;  %vm549_vm10 = vcmp.eq.f32.partialorder %v526_v34, %v2022_v8  ;;  %vm2588_vm11 = vcmp.ge.f32.partialorder %v2022_v8, 0.5  ;;  %vm611_vm12 = vcmp.lt.f32.partialorder %v2022_v8, 0.4 }
 0x1b1   : > { %vm550_vm15 = vcmp.eq.f32.partialorder %v1977_v27, %v2026_v11  ;;  %v2051_v24 = vsel %vm549_vm10, %v1968_v31, 8  ;;  %vm2587_vm8 = vcmp.ge.f32.partialorder %v2026_v11, 0.5  ;;  %vm612_vm4 = vcmp.lt.f32.partialorder %v2026_v11, 0.4  ;;  %vm2057_vm0 = vmor %vm2588_vm11, %vm611_vm12 }
 0x1b2   : > { %vm551_vm3 = vcmp.eq.f32.partialorder %v1983_v36, %v2031_v15  ;;  %v2064_v25 = vsel %vm550_vm15, %v1968_v31, 8  ;;  %vm2586_vm2 = vcmp.ge.f32.partialorder %v2031_v15, 0.5  ;;  %vm2069_vm10 = vmor %vm2587_vm8, %vm612_vm4  ;;  %vm613_vm12 = vcmp.lt.f32.partialorder %v2031_v15, 0.4 }
 0x1b3   : > { %v2075_v33 = vsel %vm551_vm3, %v1968_v31, 8  ;;  %v886_v34 = vadd.f32 %v1943_v2, %v885_v10  ;;  %vm2083_vm15 = vmor %vm887_vm6, %vm888_vm7  ;;  %vm2087_vm4 = vcmp.eq.f32.partialorder %v891_v14, 8.507059e+37  ;;  %v555_v36 = vrot.slane %v2051_v24, 4  ;;  %v313_v10 = vld [vmem:[%s1851_s12 + $0x8] sm:$0xff] }
 0x1b4   : > { %v2095_v17 = vsel %vm2587_vm8, 1.0, %v2589_v19  ;;  %v1393_v40 = vsel %vm2586_vm2, 1.0, %v2589_v19  ;;  %vm2102_vm6 = vmor %vm2586_vm2, %vm613_vm12  ;;  %v564_v44 = vrot.slane %v2064_v25, 4  ;;  %vm2621_vm7 = vweird.f32 %v1961_v16 }
 0x1b5   : > { %v2111_v45 = vmul.f32 %v1393_v40, %v1972_v32  ;;  %v1144_v46 = vrot.slane %v2095_v17, 7  ;;  %vm2119_vm3 = vmor %vm2621_vm7, %vm873_vm9  ;;  %v573_v48 = vrot.slane %v2075_v33, 4  ;;  %v2127_v28 = vsel %vm2588_vm11, 1.0, %v2589_v19 }
 0x1b6   : > { %v890_v16 = vsel %vm2083_vm15, %v1943_v2, %v886_v34  ;;  %vm2136_vm9 = vcmp.lt.s32.totalorder %v2051_v24, %v555_v36  ;;  %v875_v59 = vsel %vm2119_vm3, %v2006_v55, %v871_v47  ;;  %vm2151_vm12 = vcmp.lt.s32.totalorder %v2064_v25, %v564_v44  ;;  %v314_v34 = vld [vmem:[%s1851_s12 + $0x10] sm:$0xff] }
 0x1b7   : > { %v1145_v50 = vrot.slane %v2111_v45, 6  ;;  %v1146_v51 = vsel %vm2624_vm13, %v2127_v28, %v1144_v46  ;;  %vm2629_vm15 = vcmask 1041408   ;;  %vm2165_vm5 = vcmp.lt.s32.totalorder %v2075_v33, %v573_v48 }
 0x1b8   : > { %v2171_v1 = vsel %vm2087_vm4, %v894_v22, %v890_v16  ;;  %1542 = vrcp.f32 %v2148_v60  ;;  %v2177_v37 = vsel %vm2044_vm14, %v2014_v3, %v875_v59  ;;  %v933_v7 = vand.u32 2147483648, %v2148_v60  ;;  %v2189_v3 = vpop.eup %1540 }
 0x1b9   : > { %v1147_v61 = vsel %vm2629_vm15, %v1146_v51, %v1145_v50  ;;  %1544 = vrcp.f32 %v2157_v62  ;;  %v948_v9 = vand.u32 2147483648, %v2157_v62  ;;  %vm927_vm14 = vweird.f32 %v2148_v60 }
 0x1ba   : > { %v1149_v0 = vadd.f32 %v1147_v61, %v1140_v49  ;;  %1546 = vrcp.f32 %v2160_v63  ;;  %v931_v12 = vand.u32 2147483647, %v2148_v60  ;;  %v963_v14 = vand.u32 2147483648, %v2160_v63 }
 0x1bb   : > { %v898_v23 = vmul.f32 0.1, %v2189_v3  ;;  %vm942_vm4 = vweird.f32 %v2157_v62  ;;  %1548 = vrcp.f32 %v1727_v29  ;;  %v961_v27 = vand.u32 2147483647, %v2160_v63 }
 0x1bc   : > { %1150 = vst.msk [vmem:[#allocation3] sm:$0x7] %vm1874_vm1, %v1149_v0  ;;  %v315_v35 = vmax.f32 %v312_v4, 0.0001  ;;  %v316_v40 = vmax.f32 %v313_v10, 0.0001  ;;  %v557_v22 = vsel %vm2136_vm9, %v2051_v24, %v555_v36  ;;  %v566_v56 = vsel %vm2151_vm12, %v2064_v25, %v564_v44  ;;  %v2241_v10 = vpop.permute.xlu1 %624 }
 0x1bd   : > { %v899_v46 = vsub.f32 1.0, %v898_v23  ;;  %v2203_v47 = vor.u32 1.1754944e-38, %v933_v7  ;;  %v2205_v20 = vor.u32 1.1754944e-38, %v948_v9  ;;  %v2215_v51 = vor.u32 1.1754944e-38, %v963_v14 }
 0x1be   : > { %v2201_v41 = vpop.eup %1542  ;;  %v317_v16 = vmax.f32 %v314_v34, 0.0001  ;;  %vm2222_vm9 = vcmp.eq.f32.partialorder %v931_v12, 8.507059e+37  ;;  %v2228_v57 = vmin.f32 %v315_v35, 0.9999  ;;  %vm2230_vm15 = vcmp.eq.f32.partialorder %v946_v21, 8.507059e+37 }
 0x1bf   : > { %v2210_v49 = vpop.eup %1544  ;;  %v923_v50 = vmul.f32 %v2201_v41, %v2148_v60  ;;  %v900_v61 = vmul.f32 %v2189_v3, %v899_v46  ;;  %vm928_vm13 = vweird.f32 %v2201_v41  ;;  %vm2235_vm12 = vcmp.eq.f32.partialorder %v961_v27, 8.507059e+37  ;;  %v2267_v60 = vpop.permute.xlu2 %786 }
 0x1c0   : > { %v1547_v59 = vpop.eup %1546  ;;  %v938_v36 = vmul.f32 %v2210_v49, %v2157_v62  ;;  %v2239_v2 = vmin.f32 %v316_v40, 0.9999  ;;  %v558_v7 = vrot.slane %v557_v22, 2  ;;  %vm943_vm2 = vweird.f32 %v2210_v49  ;;  %vm2255_vm11 = vmor %vm927_vm14, %vm928_vm13 }
 0x1c1   : > { %v924_v0 = vsub.f32 1.0, %v923_v50  ;;  %v953_v25 = vmul.f32 %v1547_v59, %v2160_v63  ;;  %v1549_v9 = vpop.eup %1548  ;;  %v567_v14 = vrot.slane %v566_v56, 2  ;;  %v575_v34 = vsel %vm2165_vm5, %v2075_v33, %v573_v48  ;;  %vm2263_vm8 = vmor %vm942_vm4, %vm943_vm2 }
 0x1c2   : > { %v939_v12 = vsub.f32 1.0, %v938_v36  ;;  %v980_v29 = vmul.f32 0.2, %v1549_v9  ;;  %v901_v27 = vadd.f32 %v2189_v3, %v900_v61  ;;  %vm559_vm3 = vcmp.lt.s32.totalorder %v557_v22, %v558_v7 }
 0x1c3   : > { %v925_v23 = vmul.f32 %v2201_v41, %v924_v0  ;;  %v954_v21 = vsub.f32 1.0, %v953_v25  ;;  %vm568_vm7 = vcmp.lt.s32.totalorder %v566_v56, %v567_v14  ;;  %v560_v50 = vsel %vm559_vm3, %v557_v22, %v558_v7 }
 0x1c4   : > { %v940_v40 = vmul.f32 %v2210_v49, %v939_v12  ;;  %v981_v55 = vsub.f32 1.0, %v980_v29  ;;  %vm2642_vm5 = vweird.f32 %v1547_v59  ;;  %vm2643_vm14 = vweird.f32 %v2160_v63 }
 0x1c5   : > { %v926_v46 = vadd.f32 %v2201_v41, %v925_v23  ;;  %v955_v48 = vmul.f32 %v1547_v59, %v954_v21  ;;  %vm2273_vm13 = vmor %vm2643_vm14, %vm2642_vm5  ;;  %v561_v0 = vrot.slane %v560_v50, 1  ;;  %v569_v62 = vsel %vm568_vm7, %v566_v56, %v567_v14 }
 0x1c6   : > { %v941_v61 = vadd.f32 %v2210_v49, %v940_v40  ;;  %v576_v25 = vrot.slane %v575_v34, 2  ;;  %v982_v23 = vmul.f32 %v1549_v9, %v981_v55  ;;  %v2277_v13 = vmin.f32 %v317_v16, 0.9999  ;;  %v735_v40 = vpop.permute.xlu1 %734 }
 0x1c7   : > { %v956_v12 = vadd.f32 %v1547_v59, %v955_v48  ;;  %v570_v21 = vrot.slane %v569_v62, 1  ;;  %v930_v22 = vsel %vm2255_vm11, %v2201_v41, %v926_v46  ;;  %vm984_vm2 = vweird.f32 %v1549_v9  ;;  %v760_v4 = vpop.permute.xlu2 %759 }
 0x1c8   : > { %vm562_vm4 = vcmp.lt.s32.totalorder %v560_v50, %v561_v0  ;;  %vm577_vm3 = vcmp.lt.s32.totalorder %v575_v34, %v576_v25  ;;  %v945_v63 = vsel %vm2263_vm8, %v2210_v49, %v941_v61  ;;  %v983_v7 = vadd.f32 %v1549_v9, %v982_v23 }
 0x1c9   : > { %v960_v56 = vsel %vm2273_vm13, %v1547_v59, %v956_v12  ;;  %v563_v14 = vsel %vm562_vm4, %v560_v50, %v561_v0  ;;  %vm2646_vm7 = vweird.f32 %v2189_v3  ;;  %vm571_vm5 = vcmp.lt.s32.totalorder %v569_v62, %v570_v21 }
 0x1ca   : > { %v2290_v16 = vsel %vm2646_vm7, %v2189_v3, %v901_v27  ;;  %v578_v29 = vsel %vm577_vm3, %v575_v34, %v576_v25  ;;  %vm582_vm11 = vcmp.eq.s32.totalorder %v1968_v31, %v563_v14  ;;  %v2296_v41 = vsel %vm2222_vm9, %v2203_v47, %v930_v22 }
 0x1cb   : > { %v572_v49 = vsel %vm571_vm5, %v569_v62, %v570_v21  ;;  %v579_v35 = vrot.slane %v578_v29, 1  ;;  %v2299_v59 = vsel %vm582_vm11, 1.0, %v2589_v19  ;;  %v2304_v3 = vsel %vm2230_vm15, %v2205_v20, %v945_v63 }
 0x1cc   : > { %v2309_v34 = vsel %vm2235_vm12, %v2215_v51, %v960_v56  ;;  %vm583_vm8 = vcmp.eq.s32.totalorder %v1968_v31, %v572_v49  ;;  %v627_v47 = vmul.f32 %v2299_v59, %v2241_v10  ;;  %v2315_v24 = vsel %vm984_vm2, %v1549_v9, %v983_v7 }
 0x1cd   : > { %vm580_vm9 = vcmp.lt.s32.totalorder %v578_v29, %v579_v35  ;;  %v2318_v27 = vsel %vm583_vm8, 1.0, %v2589_v19  ;;  %v737_v20 = vmul.f32 %v2299_v59, %v735_v40  ;;  %v762_v9 = vmul.f32 %v2299_v59, %v760_v4 }
 0x1ce   : > { %v581_v46 = vsel %vm580_vm9, %v578_v29, %v579_v35  ;;  %v628_v51 = vmul.f32 %v2318_v27, %v2241_v10  ;;  %v630_v44 = vrot.slane %v627_v47, 4  ;;  %v738_v33 = vmul.f32 %v2318_v27, %v735_v40 }
 0x1cf   : > { %vm584_vm15 = vcmp.eq.s32.totalorder %v1968_v31, %v581_v46  ;;  %v740_v48 = vrot.slane %v737_v20, 4  ;;  %v763_v55 = vmul.f32 %v2318_v27, %v760_v4  ;;  %v765_v56 = vrot.slane %v762_v9, 4 }
 0x1d0   : > { %v2328_v50 = vsel %vm584_vm15, 1.0, %v2589_v19  ;;  %v631_v61 = vadd.f32 %v630_v44, %v627_v47  ;;  %v636_v36 = vrot.slane %v628_v51, 4  ;;  %v746_v0 = vrot.slane %v738_v33, 4 }
 0x1d1   : > { %v629_v62 = vmul.f32 %v2328_v50, %v2241_v10  ;;  %v739_v12 = vmul.f32 %v2328_v50, %v735_v40  ;;  %v741_v23 = vadd.f32 %v740_v48, %v737_v20  ;;  %v771_v49 = vrot.slane %v763_v55, 4 }
 0x1d2   : > { %v632_v21 = vrot.slane %v631_v61, 2  ;;  %v637_v22 = vadd.f32 %v636_v36, %v628_v51  ;;  %v747_v63 = vadd.f32 %v746_v0, %v738_v33  ;;  %v766_v44 = vadd.f32 %v765_v56, %v762_v9 }
 0x1d3   : > { %v642_v7 = vrot.slane %v629_v62, 4  ;;  %v742_v14 = vrot.slane %v741_v23, 2  ;;  %v752_v29 = vrot.slane %v739_v12, 4  ;;  %v772_v38 = vadd.f32 %v771_v49, %v763_v55 }
 0x1d4   : > { %v633_v35 = vadd.f32 %v632_v21, %v631_v61  ;;  %v638_v47 = vrot.slane %v637_v22, 2  ;;  %v748_v46 = vrot.slane %v747_v63, 2  ;;  %v767_v20 = vrot.slane %v766_v44, 2 }
 0x1d5   : > { %v643_v19 = vadd.f32 %v642_v7, %v629_v62  ;;  %v743_v5 = vadd.f32 %v742_v14, %v741_v23  ;;  %v753_v10 = vadd.f32 %v752_v29, %v739_v12  ;;  %v676_v51 = vsub.f32 1.0, %v2239_v2 }
 0x1d6   : > { %v634_v54 = vrot.slane %v633_v35, 1  ;;  %v639_v53 = vadd.f32 %v638_v47, %v637_v22  ;;  %v749_v40 = vadd.f32 %v748_v46, %v747_v63  ;;  %v773_v36 = vrot.slane %v772_v38, 2 }
 0x1d7   : > { %v644_v48 = vrot.slane %v643_v19, 2  ;;  %v754_v33 = vrot.slane %v753_v10, 2  ;;  %v744_v25 = vrot.slane %v743_v5, 1  ;;  %v764_v61 = vmul.f32 %v2328_v50, %v760_v4 }
 0x1d8   : > { %v635_v0 = vadd.f32 %v634_v54, %v633_v35  ;;  %v640_v52 = vrot.slane %v639_v53, 1  ;;  %v750_v9 = vrot.slane %v749_v40, 1  ;;  %v768_v23 = vadd.f32 %v767_v20, %v766_v44 }
 0x1d9   : > { %v645_v21 = vadd.f32 %v644_v48, %v643_v19  ;;  %v755_v62 = vadd.f32 %v754_v33, %v753_v10  ;;  %v677_v56 = vsub.f32 1.0, %v2277_v13  ;;  %v774_v14 = vadd.f32 %v773_v36, %v772_v38 }
 0x1da   : > { %v641_v12 = vadd.f32 %v640_v52, %v639_v53  ;;  %vm1412_vm12 = vcmp.lt.s32.totalorder %v635_v0, 0  ;;  %v1413_v55 = vceil.f32 %v635_v0  ;;  %v1414_v22 = vfloor.f32 %v635_v0 }
 0x1db   : > { %v646_v63 = vrot.slane %v645_v21, 1  ;;  %v756_v7 = vrot.slane %v755_v62, 1  ;;  %v2337_v4 = vadd.f32 %v744_v25, %v743_v5  ;;  %v2339_v19 = vadd.f32 %v750_v9, %v749_v40 }
 0x1dc   : > { %v1415_v29 = vsel %vm1412_vm12, %v1413_v55, %v1414_v22  ;;  %vm1417_vm14 = vcmp.lt.s32.totalorder %v641_v12, 0  ;;  %v1418_v54 = vceil.f32 %v641_v12  ;;  %v1419_v49 = vfloor.f32 %v641_v12 }
 0x1dd   : > { %v647_v35 = vadd.f32 %v646_v63, %v645_v21  ;;  %v1416_v47 = vcvt.f32.s32 %v1415_v29  ;;  %v769_v52 = vrot.slane %v768_v23, 1  ;;  %v777_v53 = vrot.slane %v764_v61, 4 }
 0x1de   : > { %v1420_v46 = vsel %vm1417_vm14, %v1418_v54, %v1419_v49  ;;  %v789_v44 = vmul.f32 %v2299_v59, %v2267_v60  ;;  %v2344_v48 = vadd.f32 %v756_v7, %v755_v62  ;;  %v775_v33 = vrot.slane %v774_v14, 1 }
 0x1df   : > { %v1421_v10 = vcvt.f32.s32 %v1420_v46  ;;  %vm1422_vm13 = vcmp.lt.s32.totalorder %v647_v35, 0  ;;  %v1423_v20 = vceil.f32 %v647_v35  ;;  %v1424_v38 = vfloor.f32 %v647_v35  ;;  %v812_v46 = vpop.permute.xlu0 %811 }
 0x1e0   : > { %vm651_vm2 = vcmp.eq.s32.totalorder %v1968_v31, %v1416_v47  ;;  %v778_v36 = vadd.f32 %v777_v53, %v764_v61  ;;  %vm2647_vm3 = vcmp.ge.f32.partialorder %v2022_v8, 0.5  ;;  %v790_v40 = vmul.f32 %v2318_v27, %v2267_v60 }
 0x1e1   : > { %v1425_v5 = vsel %vm1422_vm13, %v1423_v20, %v1424_v38  ;;  %vm652_vm4 = vcmp.eq.s32.totalorder %v1968_v31, %v1421_v10  ;;  %vm2349_vm7 = vmand %vm2647_vm3, %vm651_vm2  ;;  %v792_v0 = vrot.slane %v789_v44, 4  ;;  %vm2650_vm5 = vcmp.ge.f32.partialorder %v2026_v11, 0.5 }
 0x1e2   : > { %v1426_v21 = vcvt.f32.s32 %v1425_v5  ;;  %vm2357_vm11 = vmand %vm2650_vm5, %vm652_vm4  ;;  %v1728_v61 = vmov 0.75   ;;  %v2653_v8 = vsub.f32 1.0, %v2228_v57  ;;  %v791_v29 = vmul.f32 %v2328_v50, %v2267_v60 }
 0x1e3   : > { %v672_v62 = vsel %vm2349_vm7, 0.25, %v1728_v61  ;;  %vm669_vm8 = vmor %vm2349_vm7, %vm2057_vm0  ;;  %v673_v22 = vsel %vm2357_vm11, 0.25, %v1728_v61  ;;  %v679_v63 = vsel %vm2357_vm11, %v676_v51, %v2239_v2  ;;  %v688_v7 = vsel %vm2357_vm11, %v2239_v2, %v676_v51 }
 0x1e4   : > { %v678_v12 = vsel %vm2349_vm7, %v2653_v8, %v2228_v57  ;;  %v2654_v55 = vmov %v2653_v8  ;;  %vm653_vm9 = vcmp.eq.s32.totalorder %v1968_v31, %v1426_v21  ;;  %vm670_vm15 = vmor %vm2357_vm11, %vm2069_vm10  ;;  %v779_v54 = vrot.slane %v778_v36, 2 }
 0x1e5   : > { %v687_v11 = vsel %vm2349_vm7, %v2228_v57, %v2654_v55  ;;  %v681_v57 = vmul.f32 %v678_v12, %v672_v62  ;;  %vm2655_vm12 = vcmp.ge.f32.partialorder %v2031_v15, 0.5  ;;  %v682_v2 = vmul.f32 %v679_v63, %v673_v22 }
 0x1e6   : > { %1550 = vlog2.f32 %v687_v11  ;;  %vm2394_vm14 = vmand %vm2655_vm12, %vm653_vm9  ;;  %v793_v51 = vadd.f32 %v792_v0, %v789_v44  ;;  %v798_v60 = vrot.slane %v790_v40, 4  ;;  %v2407_v35 = vadd.f32 %v769_v52, %v768_v23 }
 0x1e7   : > { %1552 = vlog2.f32 %v688_v7  ;;  %vm671_vm13 = vmor %vm2394_vm14, %vm2102_vm6  ;;  %v674_v31 = vsel %vm2394_vm14, 0.25, %v1728_v61  ;;  %v689_v15 = vsel %vm2394_vm14, %v2277_v13, %v677_v56  ;;  %v2409_v47 = vadd.f32 %v775_v33, %v774_v14 }
 0x1e8   : > { %v680_v53 = vsel %vm2394_vm14, %v677_v56, %v2277_v13  ;;  %1554 = vlog2.f32 %v689_v15  ;;  %v780_v44 = vadd.f32 %v779_v54, %v778_v36  ;;  %v794_v10 = vrot.slane %v793_v51, 2 }
 0x1e9   : > { %v799_v20 = vadd.f32 %v798_v60, %v790_v40  ;;  %v804_v38 = vrot.slane %v791_v29, 4  ;;  %v814_v5 = vmul.f32 %v2299_v59, %v812_v46  ;;  %v815_v0 = vmul.f32 %v2318_v27, %v812_v46 }
 0x1ea   : > { %v684_v21 = vmul.f32 %v681_v57, %v678_v12  ;;  %v685_v61 = vmul.f32 %v682_v2, %v679_v63  ;;  %v795_v23 = vadd.f32 %v794_v10, %v793_v51  ;;  %v816_v14 = vmul.f32 %v2328_v50, %v812_v46 }
 0x1eb   : > { %v800_v33 = vrot.slane %v799_v20, 2  ;;  %v805_v62 = vadd.f32 %v804_v38, %v791_v29  ;;  %v817_v8 = vrot.slane %v814_v5, 4  ;;  %v823_v55 = vrot.slane %v815_v0, 4 }
 0x1ec   : > { %v1551_v52 = vpop.eup %1550  ;;  %v683_v56 = vmul.f32 %v680_v53, %v674_v31  ;;  %v781_v11 = vrot.slane %v780_v44, 1  ;;  %v829_v40 = vrot.slane %v816_v14, 4  ;;  %v796_v63 = vrot.slane %v795_v23, 1 }
 0x1ed   : > { %v1553_v13 = vpop.eup %1552  ;;  %v691_v36 = vmul.f32 0.6931472, %v1551_v52  ;;  %v801_v7 = vadd.f32 %v800_v33, %v799_v20  ;;  %v806_v59 = vrot.slane %v805_v62, 2  ;;  %v818_v54 = vadd.f32 %v817_v8, %v814_v5 }
 0x1ee   : > { %v693_v22 = vmul.f32 0.6931472, %v1553_v13  ;;  %v1555_v27 = vpop.eup %1554  ;;  %v824_v57 = vadd.f32 %v823_v55, %v815_v0  ;;  %v830_v2 = vadd.f32 %v829_v40, %v816_v14  ;;  %v686_v38 = vmul.f32 %v683_v56, %v680_v53 }
 0x1ef   : > { %v696_v12 = vsub.f32 0.0, %v691_v36  ;;  %v695_v50 = vmul.f32 0.6931472, %v1555_v27  ;;  %v802_v60 = vrot.slane %v801_v7, 1  ;;  %v807_v29 = vadd.f32 %v806_v59, %v805_v62 }
 0x1f0   : > { %v697_v51 = vsub.f32 0.0, %v693_v22  ;;  %v819_v46 = vrot.slane %v818_v54, 2  ;;  %v825_v10 = vrot.slane %v824_v57, 2  ;;  %v831_v31 = vrot.slane %v830_v2, 2 }
 0x1f1   : > { %v699_v15 = vmul.f32 %v696_v12, %v684_v21  ;;  %v698_v52 = vsub.f32 0.0, %v695_v50  ;;  %v782_v13 = vadd.f32 %v781_v11, %v780_v44  ;;  %v808_v5 = vrot.slane %v807_v29, 1 }
 0x1f2   : > { %v700_v42 = vmul.f32 %v697_v51, %v685_v61  ;;  %v820_v0 = vadd.f32 %v819_v46, %v818_v54  ;;  %v826_v14 = vadd.f32 %v825_v10, %v824_v57  ;;  %v832_v61 = vadd.f32 %v831_v31, %v830_v2 }
 0x1f3   : > { %v702_v20 = vsel %vm669_vm8, %v699_v15, 0.0  ;;  %v701_v33 = vmul.f32 %v698_v52, %v686_v38  ;;  %v797_v62 = vadd.f32 %v796_v63, %v795_v23  ;;  %v803_v25 = vadd.f32 %v802_v60, %v801_v7 }
 0x1f4   : > { %v703_v53 = vsel %vm670_vm15, %v700_v42, 0.0  ;;  %v705_v21 = vrot.slane %v702_v20, 4  ;;  %v821_v8 = vrot.slane %v820_v0, 1  ;;  %v2658_v56 = vperm.slane %v1987_v39, 0 }
 0x1f5   : > { %v711_v44 = vrot.slane %v703_v53, 4  ;;  %v704_v6 = vsel %vm671_vm13, %v701_v33, 0.0  ;;  %v844_v42 = vsub.f32 %v2339_v19, %v2659_v26  ;;  %v809_v11 = vadd.f32 %v808_v5, %v807_v29  ;;  %v2461_v5 = vld [vmem:[%s294_s5] sm:$0xff]  ;;  %v2466_v33 = vld [vmem:[%s294_s5 + $0x8] sm:$0xf] }
 0x1f6   : > { %v706_v55 = vadd.f32 %v705_v21, %v702_v20  ;;  %v843_v9 = vsub.f32 %v2337_v4, %v2658_v56  ;;  %v717_v23 = vrot.slane %v704_v6, 4  ;;  %v827_v40 = vrot.slane %v826_v14, 1 }
 0x1f7   : > { %v712_v36 = vadd.f32 %v711_v44, %v703_v53  ;;  %v833_v49 = vrot.slane %v832_v61, 1  ;;  %v845_v7 = vsub.f32 %v2344_v48, %v2660_v43  ;;  %v881_v4 = vmul.f32 %v2177_v37, %v844_v42 }
 0x1f8   : > { %v707_v22 = vrot.slane %v706_v55, 2  ;;  %v866_v59 = vmul.f32 %v2142_v58, %v843_v9  ;;  %v718_v27 = vadd.f32 %v717_v23, %v704_v6  ;;  %v2661_v12 = vperm.slane %v1987_v39, 1 }
 0x1f9   : > { %v713_v54 = vrot.slane %v712_v36, 2  ;;  %v822_v57 = vadd.f32 %v821_v8, %v820_v0  ;;  %v896_v2 = vmul.f32 %v2171_v1, %v845_v7  ;;  %v2662_v50 = vperm.slane %v1987_v39, 5 }
 0x1fa   : > { %v913_v19 = vsub.f32 %v2407_v35, %v2661_v12  ;;  %v708_v63 = vadd.f32 %v707_v22, %v706_v55  ;;  %v719_v60 = vrot.slane %v718_v27, 2  ;;  %v828_v29 = vadd.f32 %v827_v40, %v826_v14 }
 0x1fb   : > { %v914_v51 = vsub.f32 %v2409_v47, %v2662_v50  ;;  %v714_v48 = vadd.f32 %v713_v54, %v712_v36  ;;  %v2663_v15 = vperm.slane %v1990_v30, 1  ;;  %v834_v10 = vadd.f32 %v833_v49, %v832_v61 }
 0x1fc   : > { %v904_v35 = vmul.f32 %v2290_v16, %v866_v59  ;;  %v936_v31 = vmul.f32 %v2296_v41, %v913_v19  ;;  %v709_v39 = vrot.slane %v708_v63, 1  ;;  %v720_v52 = vadd.f32 %v719_v60, %v718_v27 }
 0x1fd   : > { %v915_v46 = vsub.f32 %v782_v13, %v2663_v15  ;;  %v951_v38 = vmul.f32 %v2304_v3, %v914_v51  ;;  %v905_v47 = vmul.f32 %v2290_v16, %v881_v4  ;;  %v970_v20 = vmul.f32 %v2142_v58, %v797_v62 }
 0x1fe   : > { %v715_v0 = vrot.slane %v714_v48, 1  ;;  %v906_v14 = vmul.f32 %v2290_v16, %v896_v2  ;;  %v971_v13 = vmul.f32 %v2177_v37, %v803_v25  ;;  %v721_v53 = vrot.slane %v720_v52, 1 }
 0x1ff   : > { %v966_v30 = vmul.f32 %v2309_v34, %v915_v46  ;;  %v967_v21 = vmul.f32 %v936_v31, %v2290_v16  ;;  %v968_v61 = vmul.f32 %v951_v38, %v2290_v16  ;;  %v972_v44 = vmul.f32 %v2171_v1, %v809_v11 }
 0x200   : > { %1556 = vlog2.f32 %v970_v20  ;;  %v989_v58 = vmul.f32 %v2296_v41, %v822_v57  ;;  %v990_v62 = vmul.f32 %v2304_v3, %v828_v29  ;;  %v991_v8 = vmul.f32 %v2309_v34, %v834_v10 }
 0x201   : > { %v722_v6 = vadd.f32 %v721_v53, %v720_v52  ;;  %1558 = vlog2.f32 %v971_v13  ;;  %v1003_v37 = vperm.slane %v2461_v5, 0  ;;  %v1004_v25 = vperm.slane %v2461_v5, 4 }
 0x202   : > { %1560 = vlog2.f32 %v972_v44  ;;  %v1005_v55 = vperm.slane %v2466_v33, 0  ;;  %v1030_v56 = vperm.slane %v2461_v5, 1  ;;  %v1031_v1 = vperm.slane %v2461_v5, 5 }
 0x203   : > { %v969_v9 = vmul.f32 %v966_v30, %v2290_v16  ;;  %1562 = vlog2.f32 %v989_v58  ;;  %v1009_v41 = vsub.f32 %v904_v35, %v1003_v37  ;;  %v1010_v3 = vsub.f32 %v905_v47, %v1004_v25 }
 0x204   : > { %1564 = vlog2.f32 %v990_v62  ;;  %v1011_v34 = vsub.f32 %v906_v14, %v1005_v55  ;;  %v1032_v26 = vperm.slane %v2466_v33, 1  ;;  %v1036_v42 = vsub.f32 %v967_v21, %v1030_v56 }
 0x205   : > { %v2481_v36 = vadd.f32 %v709_v39, %v708_v63  ;;  %1566 = vlog2.f32 %v991_v8  ;;  %v1012_v23 = vand.u32 2147483647, %v1009_v41  ;;  %v1013_v11 = vand.u32 2147483647, %v1010_v3 }
 0x206   : > { %v1557_v40 = vpop.eup %1556  ;;  %v2483_v22 = vadd.f32 %v715_v0, %v714_v48  ;;  %v2486_v49 = vmul.f32 %v1972_v32, %v722_v6  ;;  %v1014_v16 = vand.u32 2147483647, %v1011_v34  ;;  %v1037_v43 = vsub.f32 %v968_v61, %v1031_v1 }
 0x207   : > { %v1559_v7 = vpop.eup %1558  ;;  %v974_v59 = vmul.f32 0.6931472, %v1557_v40  ;;  %v1038_v54 = vsub.f32 %v969_v9, %v1032_v26  ;;  %v1039_v27 = vand.u32 2147483647, %v1036_v42  ;;  %v1060_v4 = vperm.slane %v2461_v5, 2 }
 0x208   : > { %v1561_v12 = vpop.eup %1560  ;;  %v976_v19 = vmul.f32 0.6931472, %v1559_v7  ;;  %vm1015_vm0 = vcmp.le.f32.partialorder %v1012_v23, 0.11111111  ;;  %v1018_v63 = vmul.f32 4.5, %v1012_v23  ;;  %v1019_v57 = vmul.f32 4.5, %v1013_v11 }
 0x209   : > { %v1563_v2 = vpop.eup %1562  ;;  %v978_v50 = vmul.f32 0.6931472, %v1561_v12  ;;  %v986_v51 = vmul.f32 %v2315_v24, %v974_v59  ;;  %vm1016_vm10 = vcmp.le.f32.partialorder %v1013_v11, 0.11111111  ;;  %v1020_v32 = vmul.f32 4.5, %v1014_v16 }
 0x20a   : > { %v1565_v48 = vpop.eup %1564  ;;  %v993_v60 = vmul.f32 0.6931472, %v1563_v2  ;;  %vm1017_vm6 = vcmp.le.f32.partialorder %v1014_v16, 0.11111111  ;;  %v1021_v29 = vmul.f32 %v1018_v63, %v1012_v23  ;;  %v1022_v15 = vmul.f32 %v1019_v57, %v1013_v11 }
 0x20b   : > { %v1394_v46 = vadd.f32 -0.055555556, %v1012_v23  ;;  %v1567_v10 = vpop.eup %1566  ;;  %v987_v35 = vmul.f32 %v2315_v24, %v976_v19  ;;  %v988_v31 = vmul.f32 %v2315_v24, %v978_v50  ;;  %v995_v38 = vmul.f32 0.6931472, %v1565_v48 }
 0x20c   : > { %v1023_v39 = vmul.f32 %v1020_v32, %v1014_v16  ;;  %v997_v52 = vmul.f32 0.6931472, %v1567_v10  ;;  %v998_v47 = vmul.f32 %v993_v60, %v2315_v24  ;;  %v1395_v20 = vadd.f32 -0.055555556, %v1013_v11 }
 0x20d   : > { %v1396_v0 = vadd.f32 -0.055555556, %v1014_v16  ;;  %v999_v14 = vmul.f32 %v995_v38, %v2315_v24  ;;  %v1027_v30 = vsel %vm1015_vm0, %v1021_v29, %v1394_v46  ;;  %v1040_v13 = vand.u32 2147483647, %v1037_v43 }
 0x20e   : > { %v1041_v53 = vand.u32 2147483647, %v1038_v54  ;;  %v1000_v21 = vmul.f32 %v997_v52, %v2315_v24  ;;  %v1028_v61 = vsel %vm1016_vm10, %v1022_v15, %v1395_v20  ;;  %vm1042_vm2 = vcmp.le.f32.partialorder %v1039_v27, 0.11111111  ;;  %v1187_v20 = vld [vmem:[#allocation3] sm:$0x7] }
 0x20f   : > { %v1045_v44 = vmul.f32 4.5, %v1039_v27  ;;  %vm1043_vm4 = vcmp.le.f32.partialorder %v1040_v13, 0.11111111  ;;  %v1046_v58 = vmul.f32 4.5, %v1040_v13  ;;  %v1397_v6 = vadd.f32 -0.055555556, %v1039_v27 }
 0x210   : > { %vm1044_vm3 = vcmp.le.f32.partialorder %v1041_v53, 0.11111111  ;;  %v1047_v62 = vmul.f32 4.5, %v1041_v53  ;;  %v1398_v37 = vadd.f32 -0.055555556, %v1040_v13  ;;  %v1061_v1 = vperm.slane %v2461_v5, 6 }
 0x211   : > { %v1048_v8 = vmul.f32 %v1045_v44, %v1039_v27  ;;  %v1399_v25 = vadd.f32 -0.055555556, %v1041_v53  ;;  %v1049_v55 = vmul.f32 %v1046_v58, %v1040_v13  ;;  %v1062_v9 = vperm.slane %v2466_v33, 2 }
 0x212   : > { %v1050_v56 = vmul.f32 %v1047_v62, %v1041_v53  ;;  %v1066_v24 = vsub.f32 %v986_v51, %v1060_v4  ;;  %v1090_v3 = vperm.slane %v2461_v5, 3  ;;  %v1091_v34 = vperm.slane %v2461_v5, 7  ;;  %v1123_v53 = vld [vmem:[#allocation2] sm:$0x7] }
 0x213   : > { %v1054_v41 = vsel %vm1042_vm2, %v1048_v8, %v1397_v6  ;;  %v1029_v26 = vsel %vm1017_vm6, %v1023_v39, %v1396_v0  ;;  %v1055_v42 = vsel %vm1043_vm4, %v1049_v55, %v1398_v37  ;;  %v1067_v11 = vsub.f32 %v987_v35, %v1061_v1 }
 0x214   : > { %v1056_v23 = vsel %vm1044_vm3, %v1050_v56, %v1399_v25  ;;  %v1057_v40 = vadd.f32 %v1054_v41, %v1027_v30  ;;  %v1058_v43 = vadd.f32 %v1055_v42, %v1028_v61  ;;  %v1068_v7 = vsub.f32 %v988_v31, %v1062_v9 }
 0x215   : > { %v1069_v59 = vand.u32 2147483647, %v1066_v24  ;;  %v1070_v54 = vand.u32 2147483647, %v1067_v11  ;;  %v1092_v27 = vperm.slane %v2466_v33, 3  ;;  %v1096_v12 = vsub.f32 %v998_v47, %v1090_v3 }
 0x216   : > { %v1097_v4 = vsub.f32 %v999_v14, %v1091_v34  ;;  %v1059_v19 = vadd.f32 %v1056_v23, %v1029_v26  ;;  %v1071_v63 = vand.u32 2147483647, %v1068_v7  ;;  %v1127_v2 = vrot.slane %v2483_v22, 7 }
 0x217   : > { %vm1072_vm7 = vcmp.le.f32.partialorder %v1069_v59, 0.11111111  ;;  %v1075_v5 = vmul.f32 4.5, %v1069_v59  ;;  %vm1073_vm5 = vcmp.le.f32.partialorder %v1070_v54, 0.11111111  ;;  %v1076_v16 = vmul.f32 4.5, %v1070_v54 }
 0x218   : > { %v1098_v57 = vsub.f32 %v1000_v21, %v1092_v27  ;;  %vm1074_vm11 = vcmp.le.f32.partialorder %v1071_v63, 0.11111111  ;;  %v1077_v50 = vmul.f32 4.5, %v1071_v63  ;;  %v1400_v32 = vadd.f32 -0.055555556, %v1069_v59 }
 0x219   : > { %v1078_v51 = vmul.f32 %v1075_v5, %v1069_v59  ;;  %v1079_v48 = vmul.f32 %v1076_v16, %v1070_v54  ;;  %v1401_v60 = vadd.f32 -0.055555556, %v1070_v54  ;;  %v1099_v29 = vand.u32 2147483647, %v1096_v12  ;;  %v1151_v54 = vld [vmem:[#allocation4] sm:$0x7] }
 0x21a   : > { %v1100_v15 = vand.u32 2147483647, %v1097_v4  ;;  %v1080_v33 = vmul.f32 %v1077_v50, %v1071_v63  ;;  %v1402_v46 = vadd.f32 -0.055555556, %v1071_v63  ;;  %v1101_v35 = vand.u32 2147483647, %v1098_v57 }
 0x21b   : > { %v1084_v10 = vsel %vm1072_vm7, %v1078_v51, %v1400_v32  ;;  %v1085_v31 = vsel %vm1073_vm5, %v1079_v48, %v1401_v60  ;;  %vm1102_vm8 = vcmp.le.f32.partialorder %v1099_v29, 0.11111111  ;;  %v1128_v39 = vrot.slane %v2486_v49, 6 }
 0x21c   : > { %v1087_v38 = vadd.f32 %v1084_v10, %v1057_v40  ;;  %v1086_v22 = vsel %vm1074_vm11, %v1080_v33, %v1402_v46  ;;  %v1088_v52 = vadd.f32 %v1085_v31, %v1058_v43  ;;  %vm1103_vm9 = vcmp.le.f32.partialorder %v1100_v15, 0.11111111 }
 0x21d   : > { %v1105_v47 = vmul.f32 4.5, %v1099_v29  ;;  %v1089_v0 = vadd.f32 %v1086_v22, %v1059_v19  ;;  %v1106_v14 = vmul.f32 4.5, %v1100_v15  ;;  %v1107_v30 = vmul.f32 4.5, %v1101_v35 }
 0x21e   : > { %v1403_v13 = vadd.f32 -0.055555556, %v1099_v29  ;;  %v1404_v61 = vadd.f32 -0.055555556, %v1100_v15  ;;  %v1405_v44 = vadd.f32 -0.055555556, %v1101_v35 }
 0x21f   : > { %v1108_v21 = vmul.f32 %v1105_v47, %v1099_v29  ;;  %vm2664_vm15 = vcmask 1040384   ;;  %v1109_v62 = vmul.f32 %v1106_v14, %v1100_v15  ;;  %v1110_v8 = vmul.f32 %v1107_v30, %v1101_v35 }
 0x220   : > { %v1130_v58 = vsel %vm2664_vm15, %v2481_v36, %v1127_v2  ;;  %vm2665_vm12 = vcmask 1041408   ;;  %v1189_v6 = vperm.slane %v1187_v20, 0  ;;  %vm1104_vm14 = vcmp.le.f32.partialorder %v1101_v35, 0.11111111  ;;  %vm2666_vm13 = vmmov %vm2664_vm15 }
 0x221   : > { %v1132_v49 = vsel %vm2665_vm12, %v1130_v58, %v1128_v39  ;;  %v1190_v25 = vperm.slane %v1187_v20, 1  ;;  %v1191_v55 = vperm.slane %v1187_v20, 2  ;;  %v1114_v56 = vsel %vm1102_vm8, %v1108_v21, %v1403_v13  ;;  %vm2667_vm0 = vmmov %vm2666_vm13 }
 0x222   : > { %v1134_v37 = vadd.f32 %v1132_v49, %v1123_v53  ;;  %v1115_v1 = vsel %vm1103_vm9, %v1109_v62, %v1404_v61  ;;  %v1116_v9 = vsel %vm1104_vm14, %v1110_v8, %v1405_v44  ;;  %v1195_v41 = vsel %vm2666_vm13, %v1189_v6, 0.0  ;;  %vm2668_vm10 = vmmov %vm2667_vm0  ;;  %v2678_v6 = vld [vmem:[#allocation14_spill] sm:$0xff] }
 0x223   : > { %v1117_v24 = vadd.f32 %v1114_v56, %v1087_v38  ;;  %v1118_v3 = vadd.f32 %v1115_v1, %v1088_v52  ;;  %v1119_v34 = vadd.f32 %v1116_v9, %v1089_v0  ;;  %v1196_v36 = vsel %vm2667_vm0, %v1190_v25, 0.0  ;;  %vm2669_vm6 = vmmov %vm2667_vm0 }
 0x224   : > { %1139 = vst.msk [vmem:[#allocation2] sm:$0x7] %vm1874_vm1, %v1134_v37  ;;  %v1197_v26 = vadd.f32 %v1196_v36, %v1195_v41  ;;  %v1198_v11 = vsel %vm2668_vm10, %v1191_v55, 0.0  ;;  %vm2670_vm2 = vmmov %vm2665_vm12  ;;  %v2677_v46 = vmov 0.0   ;;  %vm1233_vm8 = vcmp.eq.s32.totalorder %v2678_v6, 2 }
 0x225   : > { %v1121_v42 = vmul.f32 %v2095_v17, %v1118_v3  ;;  %v1122_v23 = vmul.f32 %v1119_v34, %v2111_v45  ;;  %v1120_v43 = vmul.f32 %v2127_v28, %v1117_v24  ;;  %vm2671_vm4 = vmmov %vm2667_vm0  ;;  %311 = vst [vmem:[%s2534_s8] sm:$0x1] %v2677_v46  ;;  %vm1232_vm9 = vcmp.eq.s32.totalorder %v2678_v6, 1 }
 0x226   : > { %v1199_v40 = vadd.f32 %v1198_v11, %v1197_v26  ;;  %vm2672_vm3 = vmmov %vm2667_vm0  ;;  %vm1231_vm15 = vcmp.eq.s32.totalorder %v2678_v6, 0 }
 0x227   : > { %v1155_v7 = vrot.slane %v1121_v42, 7  ;;  %v1156_v59 = vrot.slane %v1122_v23, 6  ;;  %vm2673_vm7 = vmmov %vm2667_vm0 }
 0x228   : > { %1200 = vadd.xlane.f32.xlu2 %v1199_v40  ;;  %vm2674_vm5 = vmmov %vm2667_vm0 }
 0x229   : > { %v1157_v27 = vsel %vm2669_vm6, %v1120_v43, %v1155_v7  ;;  %vm2675_vm11 = vmmov %vm2667_vm0 }
 0x22a   : > { %v1158_v12 = vsel %vm2670_vm2, %v1157_v27, %v1156_v59 }
 0x22b   : > { %v1165_v4 = vld [vmem:[#allocation2] sm:$0x7]  ;;  %v1160_v19 = vadd.f32 %v1158_v12, %v1151_v54 }
 0x22c   : > { %v1167_v63 = vperm.slane %v1165_v4, 0  ;;  %v1168_v5 = vperm.slane %v1165_v4, 1  ;;  %v1169_v17 = vperm.slane %v1165_v4, 2 }
 0x22d   : > { %1161 = vst.msk [vmem:[#allocation4] sm:$0x7] %vm1874_vm1, %v1160_v19  ;;  %vm2676_vm1 = vmmov %vm2667_vm0 }
 0x22e   : > { %v1173_v45 = vsel %vm2671_vm4, %v1167_v63, 0.0  ;;  %v1174_v28 = vsel %vm2672_vm3, %v1168_v5, 0.0  ;;  %v1176_v57 = vsel %vm2673_vm7, %v1169_v17, 0.0 }
 0x22f   : > { %v1175_v16 = vadd.f32 %v1174_v28, %v1173_v45 }
 0x231   : > { %v1177_v2 = vadd.f32 %v1176_v57, %v1175_v16 }
 0x233   : > { %1178 = vadd.xlane.f32.xlu1 %v1177_v2 }
 0x234   : > { %v1209_v50 = vld [vmem:[#allocation4] sm:$0x7] }
 0x235   : > { %v1211_v51 = vperm.slane %v1209_v50, 0  ;;  %v1212_v32 = vperm.slane %v1209_v50, 1  ;;  %v1213_v48 = vperm.slane %v1209_v50, 2 }
 0x237   : > { %v1217_v60 = vsel %vm2674_vm5, %v1211_v51, 0.0  ;;  %v1218_v29 = vsel %vm2675_vm11, %v1212_v32, 0.0  ;;  %v1220_v15 = vsel %vm2676_vm1, %v1213_v48, 0.0 }
 0x238   : > { %v1219_v18 = vadd.f32 %v1218_v29, %v1217_v60 }
 0x23a   : > { %v1221_v33 = vadd.f32 %v1220_v15, %v1219_v18 }
 0x23c   : > { %1222 = vadd.xlane.f32.xlu0 %v1221_v33 }
 0x29b   : > { %v1201_v10 = vpop.xlane.xlu2 %1200 }
 0x29c   : > { %v1202_v35 = vrot.slane %v1201_v10, 4 }
 0x29e   : > { %v1203_v31 = vadd.f32 %v1202_v35, %v1201_v10 }
 0x2a0   : > { %v1204_v38 = vrot.slane %v1203_v31, 2 }
 0x2a2   : > { %v1205_v47 = vadd.f32 %v1204_v38, %v1203_v31 }
 0x2a4   : > { %v1206_v14 = vrot.slane %v1205_v47, 1 }
 0x2a6   : > { %v1179_v39 = vpop.xlane.xlu1 %1178  ;;  %v1207_v61 = vadd.f32 %v1206_v14, %v1205_v47 }
 0x2a7   : > { %v1180_v22 = vrot.slane %v1179_v39, 4 }
 0x2a9   : > { %v1181_v52 = vadd.f32 %v1180_v22, %v1179_v39 }
 0x2ab   : > { %v1182_v20 = vrot.slane %v1181_v52, 2 }
 0x2ad   : > { %v1183_v0 = vadd.f32 %v1182_v20, %v1181_v52 }
 0x2af   : > { %v1184_v30 = vrot.slane %v1183_v0, 1  ;;  %v1223_v13 = vpop.xlane.xlu0 %1222 }
 0x2b0   : > { %v1224_v53 = vrot.slane %v1223_v13, 4 }
 0x2b1   : > { %v1185_v21 = vadd.f32 %v1184_v30, %v1183_v0 }
 0x2b2   : > { %v1225_v44 = vadd.f32 %v1224_v53, %v1223_v13 }
 0x2b3   : > { %1427 = vpush %v1185_v21 }
 0x2b4   : > { %1429 = vpush %v1207_v61  ;;  %v1226_v58 = vrot.slane %v1225_v44, 2 }
 0x2b6   : > { %v1227_v62 = vadd.f32 %v1226_v58, %v1225_v44 }
 0x2b8   : > { %v1228_v8 = vrot.slane %v1227_v62, 1 }
 0x2ba   : > { %v1229_v49 = vadd.f32 %v1228_v8, %v1227_v62 }
 0x2bc   : > { %1431 = vpush %v1229_v49 }
 0x2e4   : > { %s1428_s10 = spop %1427 }
 0x2e5   : > { %s1430_s12 = spop %1429  ;;  %v1238_v56 = vstv %s1428_s10 }
 0x2e6   : > { %v1236_v37 = vstv %s1430_s12 }
 0x2ed   : > { %s1432_s25 = spop %1431 }
 0x2ee   : > { %v1234_v25 = vstv %s1432_s25 }
 0x2ef   : > { %v1235_v55 = vsel %vm1233_vm8, %v1234_v25, 0.0 }
 0x2f0   : > { %v1237_v1 = vsel %vm1232_vm9, %v1236_v37, %v1235_v55 }
 0x2f1   : > { %v1239_v9 = vsel %vm1231_vm15, %v1238_v56, %v1237_v1 }
 0x2f2   : > { %1240 = vst [vmem:[%s2534_s8] sm:$0x1] %v1239_v9 }
 0x2f3   : > { %1655 = shalt.err (!%p1652_p13)
}
 0x2f4   : > { %1439 = dma.vmem_to_hbm [thread:$0]  (%p1829_p5), %s1253_s21, 16, %s1255_s22, %s1242_s18  }
 0x2f5 PF: > { %s1266_s6 = sand.u32 1, %s1694_s15   ;;  %p2679_p0 = scmp.ge.s32.totalorder %s1714_s20, 2 }
 0x2f6   : > { %s1267_s8 = scalar_lea.sflag [#allocation7], %s1266_s6 }
 0x2f7   : > { %p1450_p3 = pnand %p2679_p0, %p1803_p6 }
 0x2f9   : > { %p1451_p7 = pneg %p1450_p3 }
 0x2fb   : > { %1689 = dma.done.wait (%p1451_p7), %s1267_s8, 16  }
 0x2fc   : > { %1691 = vsyncadd (%p1451_p7), %s1267_s8, 4294967280  ;;  %s21_s20 = sadd.s32 1, %s1714_s20   ;;  %s2680_s15 = smov %s1698_s16 }
 0x2fd   : > { %p18_p10 = scmp.ge.s32.totalorder %s21_s20, 4   ;;  %s2681_s16 = smov %s1702_s17 }
 0x2fe   : > { %s2682_s17 = smov %s1838_s13  ;;  %s2683_s18 = smov %s1710_s19 }
 0x2ff   : > { %s2684_s19 = smov %s2686_s7  ;;  %20 = sbr.rel (!%p18_p10) target bundleno = 7 (0x7), region = 100 }
 0x304   :  { %1272 = vsyncpa [#allocation6], 1 }
 0x305   :  { %1274 = vsyncpa [#allocation6 + $0x1], 1 }
 0x306   :  { %1275 = vsyncpa [#allocation9], 1 }
 0x307   :  { %1276 = vsyncpa [#allocation7], 1 }
 0x308   :  { %1278 = vsyncpa [#allocation7 + $0x1], 1 }

</bundles_post_ra>
